<compile_context>
chip_gen: v5e
topology: v5e:2x2
jax: 0.10.0
libtpu: 0.0.40
codegen_flags: <defaults>
</compile_context>

<pallas_src>
import functools
import math

import jax
import jax.numpy as jnp
from jax import lax
from jax.experimental import pallas as pl
from jax.experimental.pallas import tpu as pltpu


NUM_HEADS = 2
NUM_LAYERS = 2
LN_EPS = 1e-12
OUT_PAD = 128          # lane-dense padded width for the fc output
TRANS_B = (((1,), (1,)), ((), ()))   # A @ B^T dimension numbers


# ----------------------------------------------------------------------------
# In-kernel math helpers
# ----------------------------------------------------------------------------
def _gelu(x):
    # tanh-approx GELU: tanh goes to the EUP (own VLIW slot), ~3 VALU ops.
    c = 0.7978845608028654  # sqrt(2/pi)
    return 0.5 * x * (1.0 + jnp.tanh(c * (x + 0.044715 * x * x * x)))


def _layernorm(x, g, b, eps):
    mu = jnp.mean(x, axis=-1, keepdims=True)
    xc = x - mu
    var = jnp.mean(xc * xc, axis=-1, keepdims=True)
    return xc * lax.rsqrt(var + eps) * g + b


# ----------------------------------------------------------------------------
# One fused kernel per batch element:
#   emb-LN -> L x (fused QKV, MHA, out-proj, add+LN, FFN+GELU, add+LN)
#   -> CLS -> fc -> GELU   (everything stays in VMEM / vregs)
# ----------------------------------------------------------------------------
def fused_bert_kernel(emb_ref, mask_ref, embln_ref,
                      wqkv_ref, wo_ref, w1_ref, w2_ref,
                      bqkv_ref, b1_ref, pvec_ref,
                      fcw_ref, fcb_ref, o_ref,
                      *, hidden, heads, layers, eps):
    dh = hidden // heads
    bf16 = jnp.bfloat16

    # embedding LayerNorm (f32)
    eln = embln_ref[...]                                    # (2, H)
    x = _layernorm(emb_ref[0], eln[0:1, :], eln[1:2, :], eps)   # (S, H) f32

    # additive attention bias built in-kernel from the (1, S) mask row (f32)
    bias = (1.0 - mask_ref[0]) * jnp.float32(-1e9)          # (1, S)

    for l in range(layers):                                 # static unroll
        pv = pvec_ref[l]                                    # (6, H) f32
        bo, ln1g, ln1b = pv[0:1, :], pv[1:2, :], pv[2:3, :]
        b2, ln2g, ln2b = pv[3:4, :], pv[4:5, :], pv[5:6, :]

        # ---- fused QKV projection (bf16 MXU, f32 accumulate) ----
        qkv = (jnp.dot(x.astype(bf16), wqkv_ref[l],
                       preferred_element_type=jnp.float32)
               + bqkv_ref[l])                               # (S, 3H) f32

        # ---- multi-head attention (1/sqrt(dh) baked into Wq at init) ----
        ctx_heads = []
        for h in range(heads):
            qh = qkv[:, h * dh:(h + 1) * dh].astype(bf16)                    # (S,dh)
            kh = qkv[:, hidden + h * dh:hidden + (h + 1) * dh].astype(bf16)
            vh = qkv[:, 2 * hidden + h * dh:2 * hidden + (h + 1) * dh].astype(bf16)

            s = lax.dot_general(qh, kh, TRANS_B,
                                preferred_element_type=jnp.float32)          # (S,S) f32
            s = s + bias
            s = s - jnp.max(s, axis=-1, keepdims=True)
            e = jnp.exp(s)
            p = e * pl.reciprocal(jnp.sum(e, axis=-1, keepdims=True),
                                  approx=True)
            ctx_heads.append(jnp.dot(p.astype(bf16), vh,
                                     preferred_element_type=jnp.float32))    # (S,dh)

        # head-major lane-contiguous context -> ONE full-width output projection
        ctx = jnp.concatenate(ctx_heads, axis=-1)           # (S, H) f32
        attn = jnp.dot(ctx.astype(bf16), wo_ref[l],
                       preferred_element_type=jnp.float32) + bo

        # ---- add & LayerNorm ----
        x = _layernorm(attn + x, ln1g, ln1b, eps)

        # ---- FFN (bf16 matmuls, f32 accumulate) ----
        inter = _gelu(jnp.dot(x.astype(bf16), w1_ref[l],
                              preferred_element_type=jnp.float32) + b1_ref[l])
        ffn = jnp.dot(inter.astype(bf16), w2_ref[l],
                      preferred_element_type=jnp.float32) + b2
        x = _layernorm(ffn + x, ln2g, ln2b, eps)

    # ---- CLS pooling + fc + GELU, lane-dense 128-wide padded output ----
    cls = x[0:1, :].astype(bf16)                            # (1, H)
    out = _gelu(jnp.dot(cls, fcw_ref[...],
                        preferred_element_type=jnp.float32) + fcb_ref[...])  # (1,128)
    o_ref[0] = out


def fused_encoder(emb, mask, p, *, batch, seq):
    layers, hidden, _ = p["wqkv"].shape
    inter = p["w1"].shape[2]
    out_pad = p["fc_w"].shape[1]

    kern = functools.partial(fused_bert_kernel, hidden=hidden,
                             heads=NUM_HEADS, layers=layers, eps=LN_EPS)

    batch_map = lambda b: (b, 0, 0)
    const3 = lambda b: (0, 0, 0)
    const2 = lambda b: (0, 0)

    in_specs = [
        pl.BlockSpec((1, seq, hidden), batch_map),              # emb (f32)
        pl.BlockSpec((1, 1, seq), batch_map),                   # mask (f32)
        pl.BlockSpec((2, hidden), const2),                      # emb LN g/b
        pl.BlockSpec((layers, hidden, 3 * hidden), const3),     # wqkv (bf16)
        pl.BlockSpec((layers, hidden, hidden), const3),         # wo   (bf16)
        pl.BlockSpec((layers, hidden, inter), const3),          # w1   (bf16)
        pl.BlockSpec((layers, inter, hidden), const3),          # w2   (bf16)
        pl.BlockSpec((layers, 1, 3 * hidden), const3),          # bqkv (f32)
        pl.BlockSpec((layers, 1, inter), const3),               # b1   (f32)
        pl.BlockSpec((layers, 6, hidden), const3),              # packed LN/bias
        pl.BlockSpec((hidden, out_pad), const2),                # fc_w padded (bf16)
        pl.BlockSpec((1, out_pad), const2),                     # fc_b padded (f32)
    ]
    out_spec = pl.BlockSpec((1, 1, out_pad), batch_map)

    return pl.pallas_call(
        kern,
        out_shape=jax.ShapeDtypeStruct((batch, 1, out_pad), jnp.float32),
        grid=(batch,),
        in_specs=in_specs,
        out_specs=out_spec,
        compiler_params=pltpu.CompilerParams(
            dimension_semantics=("parallel",),
            vmem_limit_bytes=32 * 1024 * 1024),
    )(emb, mask, p["emb_ln"], p["wqkv"], p["wo"], p["w1"], p["w2"],
      p["bqkv"], p["b1"], p["pvec"], p["fc_w"], p["fc_b"])


# ----------------------------------------------------------------------------
# Text_Encoder / Bert_Encoder forward (only the token-embedding gather and the
# narrow/mask prep stay in plain JAX)
# ----------------------------------------------------------------------------
def text_encoder_forward(params, text, item_dim):
    # Text_Encoder.forward (CLS pooling variant; bert_model_load has no 'opt')
    batch, nw2 = text.shape
    nw = nw2 // 2
    ids = text[:, :nw]                                # torch.narrow(text, 1, 0, nw)
    mask = text[:, nw:].astype(jnp.float32).reshape(batch, 1, nw)

    # TODO(synk): token-embedding gather is a data-dependent lookup; kept in
    # plain JAX.  At real dims fuse it via PrefetchScalarGridSpec row-DMA gather.
    emb = (params["word_emb"][ids]
           + params["pos_emb"][None, :nw, :]
           + params["type_emb"][0][None, None, :])    # (B, S, H) f32

    out_pad = fused_encoder(emb, mask, params, batch=batch, seq=nw)   # (B,1,128)
    return out_pad[:, 0, :item_dim]                   # slice padded lanes


def bert_encoder_forward(params, news, cfg):
    # Bert_Encoder.forward with news_attributes == ['title']
    start = cfg["attributes2start"]["title"]
    length = cfg["attributes2length"]["title"]
    text = news[:, start:start + length]              # torch.narrow
    text_vectors = [text_encoder_forward(params, text, cfg["item_dim"])]
    return text_vectors[0]                            # single-attribute path


# ----------------------------------------------------------------------------
# Deterministic parameter init, packed for the fused kernel:
#   * per-layer weights stacked on a leading L axis, QKV fused along columns,
#     1/sqrt(dh) baked into the Q columns, matmul weights stored in bf16.
#   * small per-layer vectors packed into one (L, 6, H) tensor.
#   * fc weight/bias zero-padded to a 128-wide lane-dense output.
# ----------------------------------------------------------------------------
def init_params(key, vocab, hidden, inter, max_pos, item_dim):
    keys = iter(jax.random.split(key, 64))

    def nrm(shape, scale=0.02):
        return scale * jax.random.normal(next(keys), shape, dtype=jnp.float32)

    dh = hidden // NUM_HEADS
    qscale = 1.0 / math.sqrt(dh)

    wqkv, bqkv, wo, w1, b1, w2, pvec = [], [], [], [], [], [], []
    for _ in range(NUM_LAYERS):
        wq, wk, wv = nrm((hidden, hidden)), nrm((hidden, hidden)), nrm((hidden, hidden))
        # fold attention scale into Wq (and its zero bias): zero runtime cost
        wqkv.append(jnp.concatenate([wq * qscale, wk, wv], axis=1))   # (H, 3H)
        bqkv.append(jnp.zeros((1, 3 * hidden), jnp.float32))
        wo.append(nrm((hidden, hidden)))
        w1.append(nrm((hidden, inter)))
        b1.append(jnp.zeros((1, inter), jnp.float32))
        w2.append(nrm((inter, hidden)))
        # packed hidden-width vectors: [bo, ln1_g, ln1_b, b2, ln2_g, ln2_b]
        pvec.append(jnp.stack([
            jnp.zeros((hidden,), jnp.float32),
            jnp.ones((hidden,), jnp.float32),
            jnp.zeros((hidden,), jnp.float32),
            jnp.zeros((hidden,), jnp.float32),
            jnp.ones((hidden,), jnp.float32),
            jnp.zeros((hidden,), jnp.float32),
        ]))

    fc_w = nrm((hidden, item_dim))
    fc_w_pad = jnp.zeros((hidden, OUT_PAD), jnp.float32).at[:, :item_dim].set(fc_w)
    fc_b_pad = jnp.zeros((1, OUT_PAD), jnp.float32)

    return {
        # embeddings (gather done in JAX)
        "word_emb": nrm((vocab, hidden)),
        "pos_emb": nrm((max_pos, hidden)),
        "type_emb": nrm((2, hidden)),
        "emb_ln": jnp.stack([jnp.ones((hidden,), jnp.float32),
                             jnp.zeros((hidden,), jnp.float32)]),     # (2, H)
        # per-layer stacks (matmul weights bf16, vectors f32)
        "wqkv": jnp.stack(wqkv).astype(jnp.bfloat16),
        "wo": jnp.stack(wo).astype(jnp.bfloat16),
        "w1": jnp.stack(w1).astype(jnp.bfloat16),
        "w2": jnp.stack(w2).astype(jnp.bfloat16),
        "bqkv": jnp.stack(bqkv),
        "b1": jnp.stack(b1),
        "pvec": jnp.stack(pvec),                                      # (L, 6, H)
        # Text_Encoder fc: nn.Linear(word_embedding_dim, item_embedding_dim),
        # padded to a 128-wide lane-dense output slab
        "fc_w": fc_w_pad.astype(jnp.bfloat16),
        "fc_b": fc_b_pad,
    }


# ----------------------------------------------------------------------------
if __name__ == "__main__":
    # args: news_attributes=['title'], num_words_title=8, num_words_abstract=0,
    # num_words_body=0, word_embedding_dim=32, embedding_dim=16,
    # bert_model_load='bert_tiny' (no 'opt' -> CLS Text_Encoder)
    batch = 2
    num_words_title = 8
    word_embedding_dim = 32    # BERT hidden size
    embedding_dim = 16         # item embedding dim
    intermediate = 64
    vocab = 100

    cfg = {
        "attributes2length": {"title": num_words_title * 2, "abstract": 0, "body": 0},
        "attributes2start": {"title": 0, "abstract": num_words_title * 2,
                             "body": num_words_title * 2},
        "item_dim": embedding_dim,
    }

    key = jax.random.PRNGKey(0)
    k_param, k_ids = jax.random.split(key)
    params = init_params(k_param, vocab, word_embedding_dim, intermediate,
                         num_words_title, embedding_dim)

    ids = jax.random.randint(k_ids, (batch, num_words_title), 0, vocab,
                             dtype=jnp.int32)
    valid_lens = jnp.array([5, 8], dtype=jnp.int32)
    mask = (jnp.arange(num_words_title)[None, :] < valid_lens[:, None]).astype(jnp.int32)
    news = jnp.concatenate([ids, mask], axis=1)          # (2, 16) int32

    fwd = jax.jit(functools.partial(bert_encoder_forward, cfg=cfg))
    out = fwd(params, news)
    jax.block_until_ready(out)
    assert out.shape == (batch, embedding_dim) and out.dtype == jnp.float32
    assert bool(jnp.all(jnp.isfinite(out)))
    print("KERNEL_OK")
</pallas_src>

<mosaic_0001>
module attributes {stable_mosaic.version = 11 : i64} {
  func.func @fused_bert_kernel(%arg0: i32, %arg1: memref<1x8x32xf32, #tpu.memory_space<vmem>>, %arg2: memref<1x1x8xf32, #tpu.memory_space<vmem>>, %arg3: memref<2x32xf32, #tpu.memory_space<vmem>>, %arg4: memref<2x32x96xbf16, #tpu.memory_space<vmem>>, %arg5: memref<2x32x32xbf16, #tpu.memory_space<vmem>>, %arg6: memref<2x32x64xbf16, #tpu.memory_space<vmem>>, %arg7: memref<2x64x32xbf16, #tpu.memory_space<vmem>>, %arg8: memref<2x1x96xf32, #tpu.memory_space<vmem>>, %arg9: memref<2x1x64xf32, #tpu.memory_space<vmem>>, %arg10: memref<2x6x32xf32, #tpu.memory_space<vmem>>, %arg11: memref<32x128xbf16, #tpu.memory_space<vmem>>, %arg12: memref<1x128xf32, #tpu.memory_space<vmem>>, %arg13: memref<1x1x128xf32, #tpu.memory_space<vmem>>) attributes {dimension_semantics = [#tpu.dimension_semantics<parallel>], iteration_bounds = array<i64: 2>, scalar_prefetch = 0 : i64, scratch_operands = 0 : i64, tpu.core_type = #tpu.core_type<tc>, window_params = [{transform_indices = @transform_0, window_bounds = array<i64: 1, 8, 32>}, {transform_indices = @transform_1, window_bounds = array<i64: 1, 1, 8>}, {pipeline_mode = #tpu.pipeline_mode<synchronous>, transform_indices = @transform_2, window_bounds = array<i64: 2, 32>}, {pipeline_mode = #tpu.pipeline_mode<synchronous>, transform_indices = @transform_3, window_bounds = array<i64: 2, 32, 96>}, {pipeline_mode = #tpu.pipeline_mode<synchronous>, transform_indices = @transform_4, window_bounds = array<i64: 2, 32, 32>}, {pipeline_mode = #tpu.pipeline_mode<synchronous>, transform_indices = @transform_5, window_bounds = array<i64: 2, 32, 64>}, {pipeline_mode = #tpu.pipeline_mode<synchronous>, transform_indices = @transform_6, window_bounds = array<i64: 2, 64, 32>}, {pipeline_mode = #tpu.pipeline_mode<synchronous>, transform_indices = @transform_7, window_bounds = array<i64: 2, 1, 96>}, {pipeline_mode = #tpu.pipeline_mode<synchronous>, transform_indices = @transform_8, window_bounds = array<i64: 2, 1, 64>}, {pipeline_mode = #tpu.pipeline_mode<synchronous>, transform_indices = @transform_9, window_bounds = array<i64: 2, 6, 32>}, {pipeline_mode = #tpu.pipeline_mode<synchronous>, transform_indices = @transform_10, window_bounds = array<i64: 32, 128>}, {pipeline_mode = #tpu.pipeline_mode<synchronous>, transform_indices = @transform_11, window_bounds = array<i64: 1, 128>}, {transform_indices = @transform_12, window_bounds = array<i64: 1, 1, 128>}]} {
    %c0 = arith.constant 0 : index
    %c0_0 = arith.constant 0 : index
    %0 = vector.load %arg3[%c0, %c0_0] : memref<2x32xf32, #tpu.memory_space<vmem>>, vector<2x32xf32>
    %c0_1 = arith.constant 0 : index
    %c0_2 = arith.constant 0 : index
    %c0_3 = arith.constant 0 : index
    %1 = vector.load %arg1[%c0_1, %c0_2, %c0_3] : memref<1x8x32xf32, #tpu.memory_space<vmem>>, vector<1x8x32xf32>
    %2 = vector.shape_cast %1 : vector<1x8x32xf32> to vector<8x32xf32>
    %3 = vector.extract_strided_slice %0 {offsets = [0, 0], sizes = [1, 32], strides = [1, 1]} : vector<2x32xf32> to vector<1x32xf32>
    %4 = vector.extract_strided_slice %0 {offsets = [1, 0], sizes = [1, 32], strides = [1, 1]} : vector<2x32xf32> to vector<1x32xf32>
    %cst = arith.constant dense<0.000000e+00> : vector<8xf32>
    %5 = vector.multi_reduction <add>, %2, %cst [1] : vector<8x32xf32> to vector<8xf32>
    %6 = vector.shape_cast %5 : vector<8xf32> to vector<8x1xf32>
    %cst_4 = arith.constant 3.200000e+01 : f32
    %7 = vector.broadcast %cst_4 : f32 to vector<8x1xf32>
    %8 = arith.divf %6, %7 : vector<8x1xf32>
    %9 = vector.broadcast %8 : vector<8x1xf32> to vector<8x32xf32>
    %10 = arith.subf %2, %9 : vector<8x32xf32>
    %11 = arith.mulf %10, %10 : vector<8x32xf32>
    %cst_5 = arith.constant dense<0.000000e+00> : vector<8xf32>
    %12 = vector.multi_reduction <add>, %11, %cst_5 [1] : vector<8x32xf32> to vector<8xf32>
    %13 = vector.shape_cast %12 : vector<8xf32> to vector<8x1xf32>
    %cst_6 = arith.constant 3.200000e+01 : f32
    %14 = vector.broadcast %cst_6 : f32 to vector<8x1xf32>
    %15 = arith.divf %13, %14 : vector<8x1xf32>
    %cst_7 = arith.constant 9.99999996E-13 : f32
    %16 = vector.broadcast %cst_7 : f32 to vector<8x1xf32>
    %17 = arith.addf %15, %16 : vector<8x1xf32>
    %18 = math.rsqrt %17 : vector<8x1xf32>
    %19 = vector.broadcast %18 : vector<8x1xf32> to vector<8x32xf32>
    %20 = arith.mulf %10, %19 : vector<8x32xf32>
    %21 = vector.broadcast %3 : vector<1x32xf32> to vector<8x32xf32>
    %22 = arith.mulf %20, %21 : vector<8x32xf32>
    %23 = vector.broadcast %4 : vector<1x32xf32> to vector<8x32xf32>
    %24 = arith.addf %22, %23 : vector<8x32xf32>
    %c0_8 = arith.constant 0 : index
    %c0_9 = arith.constant 0 : index
    %c0_10 = arith.constant 0 : index
    %25 = vector.load %arg2[%c0_8, %c0_9, %c0_10] : memref<1x1x8xf32, #tpu.memory_space<vmem>>, vector<1x1x8xf32>
    %26 = vector.shape_cast %25 : vector<1x1x8xf32> to vector<1x8xf32>
    %cst_11 = arith.constant 1.000000e+00 : f32
    %27 = vector.broadcast %cst_11 : f32 to vector<1x8xf32>
    %28 = arith.subf %27, %26 : vector<1x8xf32>
    %cst_12 = arith.constant -1.000000e+09 : f32
    %29 = vector.broadcast %cst_12 : f32 to vector<1x8xf32>
    %30 = arith.mulf %28, %29 : vector<1x8xf32>
    %c0_13 = arith.constant 0 : index
    %c0_14 = arith.constant 0 : index
    %c0_15 = arith.constant 0 : index
    %31 = vector.load %arg10[%c0_13, %c0_14, %c0_15] : memref<2x6x32xf32, #tpu.memory_space<vmem>>, vector<1x6x32xf32>
    %32 = vector.shape_cast %31 : vector<1x6x32xf32> to vector<6x32xf32>
    %33 = vector.extract_strided_slice %32 {offsets = [0, 0], sizes = [1, 32], strides = [1, 1]} : vector<6x32xf32> to vector<1x32xf32>
    %34 = vector.extract_strided_slice %32 {offsets = [1, 0], sizes = [1, 32], strides = [1, 1]} : vector<6x32xf32> to vector<1x32xf32>
    %35 = vector.extract_strided_slice %32 {offsets = [2, 0], sizes = [1, 32], strides = [1, 1]} : vector<6x32xf32> to vector<1x32xf32>
    %36 = vector.extract_strided_slice %32 {offsets = [3, 0], sizes = [1, 32], strides = [1, 1]} : vector<6x32xf32> to vector<1x32xf32>
    %37 = vector.extract_strided_slice %32 {offsets = [4, 0], sizes = [1, 32], strides = [1, 1]} : vector<6x32xf32> to vector<1x32xf32>
    %38 = vector.extract_strided_slice %32 {offsets = [5, 0], sizes = [1, 32], strides = [1, 1]} : vector<6x32xf32> to vector<1x32xf32>
    %39 = arith.truncf %24 : vector<8x32xf32> to vector<8x32xbf16>
    %c0_16 = arith.constant 0 : index
    %c0_17 = arith.constant 0 : index
    %c0_18 = arith.constant 0 : index
    %40 = vector.load %arg4[%c0_16, %c0_17, %c0_18] : memref<2x32x96xbf16, #tpu.memory_space<vmem>>, vector<1x32x96xbf16>
    %41 = vector.shape_cast %40 : vector<1x32x96xbf16> to vector<32x96xbf16>
    %cst_19 = arith.constant dense<0.000000e+00> : vector<8x96xf32>
    %42 = tpu.matmul %39, %41, %cst_19 {dimension_numbers = #tpu.dot_dimension_numbers<[1], [0], [0], [1], [0, 0, 1, 1], [], []>} : vector<8x32xbf16>, vector<32x96xbf16>, vector<8x96xf32> -> vector<8x96xf32>
    %c0_20 = arith.constant 0 : index
    %c0_21 = arith.constant 0 : index
    %c0_22 = arith.constant 0 : index
    %43 = vector.load %arg8[%c0_20, %c0_21, %c0_22] : memref<2x1x96xf32, #tpu.memory_space<vmem>>, vector<1x1x96xf32>
    %44 = vector.shape_cast %43 : vector<1x1x96xf32> to vector<1x96xf32>
    %45 = vector.broadcast %44 : vector<1x96xf32> to vector<8x96xf32>
    %46 = arith.addf %42, %45 : vector<8x96xf32>
    %47 = vector.extract_strided_slice %46 {offsets = [0, 0], sizes = [8, 16], strides = [1, 1]} : vector<8x96xf32> to vector<8x16xf32>
    %48 = arith.truncf %47 : vector<8x16xf32> to vector<8x16xbf16>
    %49 = vector.extract_strided_slice %46 {offsets = [0, 32], sizes = [8, 16], strides = [1, 1]} : vector<8x96xf32> to vector<8x16xf32>
    %50 = arith.truncf %49 : vector<8x16xf32> to vector<8x16xbf16>
    %51 = vector.extract_strided_slice %46 {offsets = [0, 64], sizes = [8, 16], strides = [1, 1]} : vector<8x96xf32> to vector<8x16xf32>
    %52 = arith.truncf %51 : vector<8x16xf32> to vector<8x16xbf16>
    %cst_23 = arith.constant dense<0.000000e+00> : vector<8x8xf32>
    %53 = tpu.matmul %48, %50, %cst_23 {dimension_numbers = #tpu.dot_dimension_numbers<[1], [1], [0], [0], [0, 0, 1, 0], [], []>} : vector<8x16xbf16>, vector<8x16xbf16>, vector<8x8xf32> -> vector<8x8xf32>
    %54 = vector.broadcast %30 : vector<1x8xf32> to vector<8x8xf32>
    %55 = arith.addf %53, %54 : vector<8x8xf32>
    %cst_24 = arith.constant dense<0xFF800000> : vector<8xf32>
    %56 = vector.multi_reduction <maximumf>, %55, %cst_24 [1] : vector<8x8xf32> to vector<8xf32>
    %57 = vector.shape_cast %56 : vector<8xf32> to vector<8x1xf32>
    %58 = vector.broadcast %57 : vector<8x1xf32> to vector<8x8xf32>
    %59 = arith.subf %55, %58 : vector<8x8xf32>
    %60 = math.exp %59 : vector<8x8xf32>
    %cst_25 = arith.constant dense<0.000000e+00> : vector<8xf32>
    %61 = vector.multi_reduction <add>, %60, %cst_25 [1] : vector<8x8xf32> to vector<8xf32>
    %62 = vector.shape_cast %61 : vector<8xf32> to vector<8x1xf32>
    %63 = tpu.reciprocal %62 {approx = true} : vector<8x1xf32> -> vector<8x1xf32>
    %64 = vector.broadcast %63 : vector<8x1xf32> to vector<8x8xf32>
    %65 = arith.mulf %60, %64 : vector<8x8xf32>
    %66 = arith.truncf %65 : vector<8x8xf32> to vector<8x8xbf16>
    %cst_26 = arith.constant dense<0.000000e+00> : vector<8x16xf32>
    %67 = tpu.matmul %66, %52, %cst_26 {dimension_numbers = #tpu.dot_dimension_numbers<[1], [0], [0], [1], [0, 0, 1, 1], [], []>} : vector<8x8xbf16>, vector<8x16xbf16>, vector<8x16xf32> -> vector<8x16xf32>
    %68 = vector.extract_strided_slice %46 {offsets = [0, 16], sizes = [8, 16], strides = [1, 1]} : vector<8x96xf32> to vector<8x16xf32>
    %69 = arith.truncf %68 : vector<8x16xf32> to vector<8x16xbf16>
    %70 = vector.extract_strided_slice %46 {offsets = [0, 48], sizes = [8, 16], strides = [1, 1]} : vector<8x96xf32> to vector<8x16xf32>
    %71 = arith.truncf %70 : vector<8x16xf32> to vector<8x16xbf16>
    %72 = vector.extract_strided_slice %46 {offsets = [0, 80], sizes = [8, 16], strides = [1, 1]} : vector<8x96xf32> to vector<8x16xf32>
    %73 = arith.truncf %72 : vector<8x16xf32> to vector<8x16xbf16>
    %cst_27 = arith.constant dense<0.000000e+00> : vector<8x8xf32>
    %74 = tpu.matmul %69, %71, %cst_27 {dimension_numbers = #tpu.dot_dimension_numbers<[1], [1], [0], [0], [0, 0, 1, 0], [], []>} : vector<8x16xbf16>, vector<8x16xbf16>, vector<8x8xf32> -> vector<8x8xf32>
    %75 = vector.broadcast %30 : vector<1x8xf32> to vector<8x8xf32>
    %76 = arith.addf %74, %75 : vector<8x8xf32>
    %cst_28 = arith.constant dense<0xFF800000> : vector<8xf32>
    %77 = vector.multi_reduction <maximumf>, %76, %cst_28 [1] : vector<8x8xf32> to vector<8xf32>
    %78 = vector.shape_cast %77 : vector<8xf32> to vector<8x1xf32>
    %79 = vector.broadcast %78 : vector<8x1xf32> to vector<8x8xf32>
    %80 = arith.subf %76, %79 : vector<8x8xf32>
    %81 = math.exp %80 : vector<8x8xf32>
    %cst_29 = arith.constant dense<0.000000e+00> : vector<8xf32>
    %82 = vector.multi_reduction <add>, %81, %cst_29 [1] : vector<8x8xf32> to vector<8xf32>
    %83 = vector.shape_cast %82 : vector<8xf32> to vector<8x1xf32>
    %84 = tpu.reciprocal %83 {approx = true} : vector<8x1xf32> -> vector<8x1xf32>
    %85 = vector.broadcast %84 : vector<8x1xf32> to vector<8x8xf32>
    %86 = arith.mulf %81, %85 : vector<8x8xf32>
    %87 = arith.truncf %86 : vector<8x8xf32> to vector<8x8xbf16>
    %cst_30 = arith.constant dense<0.000000e+00> : vector<8x16xf32>
    %88 = tpu.matmul %87, %73, %cst_30 {dimension_numbers = #tpu.dot_dimension_numbers<[1], [0], [0], [1], [0, 0, 1, 1], [], []>} : vector<8x8xbf16>, vector<8x16xbf16>, vector<8x16xf32> -> vector<8x16xf32>
    %89 = tpu.concatenate %67, %88 in 1 : vector<8x16xf32>, vector<8x16xf32> -> vector<8x32xf32>
    %90 = arith.truncf %89 : vector<8x32xf32> to vector<8x32xbf16>
    %c0_31 = arith.constant 0 : index
    %c0_32 = arith.constant 0 : index
    %c0_33 = arith.constant 0 : index
    %91 = vector.load %arg5[%c0_31, %c0_32, %c0_33] : memref<2x32x32xbf16, #tpu.memory_space<vmem>>, vector<1x32x32xbf16>
    %92 = vector.shape_cast %91 : vector<1x32x32xbf16> to vector<32x32xbf16>
    %cst_34 = arith.constant dense<0.000000e+00> : vector<8x32xf32>
    %93 = tpu.matmul %90, %92, %cst_34 {dimension_numbers = #tpu.dot_dimension_numbers<[1], [0], [0], [1], [0, 0, 1, 1], [], []>} : vector<8x32xbf16>, vector<32x32xbf16>, vector<8x32xf32> -> vector<8x32xf32>
    %94 = vector.broadcast %33 : vector<1x32xf32> to vector<8x32xf32>
    %95 = arith.addf %93, %94 : vector<8x32xf32>
    %96 = arith.addf %95, %24 : vector<8x32xf32>
    %cst_35 = arith.constant dense<0.000000e+00> : vector<8xf32>
    %97 = vector.multi_reduction <add>, %96, %cst_35 [1] : vector<8x32xf32> to vector<8xf32>
    %98 = vector.shape_cast %97 : vector<8xf32> to vector<8x1xf32>
    %cst_36 = arith.constant 3.200000e+01 : f32
    %99 = vector.broadcast %cst_36 : f32 to vector<8x1xf32>
    %100 = arith.divf %98, %99 : vector<8x1xf32>
    %101 = vector.broadcast %100 : vector<8x1xf32> to vector<8x32xf32>
    %102 = arith.subf %96, %101 : vector<8x32xf32>
    %103 = arith.mulf %102, %102 : vector<8x32xf32>
    %cst_37 = arith.constant dense<0.000000e+00> : vector<8xf32>
    %104 = vector.multi_reduction <add>, %103, %cst_37 [1] : vector<8x32xf32> to vector<8xf32>
    %105 = vector.shape_cast %104 : vector<8xf32> to vector<8x1xf32>
    %cst_38 = arith.constant 3.200000e+01 : f32
    %106 = vector.broadcast %cst_38 : f32 to vector<8x1xf32>
    %107 = arith.divf %105, %106 : vector<8x1xf32>
    %cst_39 = arith.constant 9.99999996E-13 : f32
    %108 = vector.broadcast %cst_39 : f32 to vector<8x1xf32>
    %109 = arith.addf %107, %108 : vector<8x1xf32>
    %110 = math.rsqrt %109 : vector<8x1xf32>
    %111 = vector.broadcast %110 : vector<8x1xf32> to vector<8x32xf32>
    %112 = arith.mulf %102, %111 : vector<8x32xf32>
    %113 = vector.broadcast %34 : vector<1x32xf32> to vector<8x32xf32>
    %114 = arith.mulf %112, %113 : vector<8x32xf32>
    %115 = vector.broadcast %35 : vector<1x32xf32> to vector<8x32xf32>
    %116 = arith.addf %114, %115 : vector<8x32xf32>
    %117 = arith.truncf %116 : vector<8x32xf32> to vector<8x32xbf16>
    %c0_40 = arith.constant 0 : index
    %c0_41 = arith.constant 0 : index
    %c0_42 = arith.constant 0 : index
    %118 = vector.load %arg6[%c0_40, %c0_41, %c0_42] : memref<2x32x64xbf16, #tpu.memory_space<vmem>>, vector<1x32x64xbf16>
    %119 = vector.shape_cast %118 : vector<1x32x64xbf16> to vector<32x64xbf16>
    %cst_43 = arith.constant dense<0.000000e+00> : vector<8x64xf32>
    %120 = tpu.matmul %117, %119, %cst_43 {dimension_numbers = #tpu.dot_dimension_numbers<[1], [0], [0], [1], [0, 0, 1, 1], [], []>} : vector<8x32xbf16>, vector<32x64xbf16>, vector<8x64xf32> -> vector<8x64xf32>
    %c0_44 = arith.constant 0 : index
    %c0_45 = arith.constant 0 : index
    %c0_46 = arith.constant 0 : index
    %121 = vector.load %arg9[%c0_44, %c0_45, %c0_46] : memref<2x1x64xf32, #tpu.memory_space<vmem>>, vector<1x1x64xf32>
    %122 = vector.shape_cast %121 : vector<1x1x64xf32> to vector<1x64xf32>
    %123 = vector.broadcast %122 : vector<1x64xf32> to vector<8x64xf32>
    %124 = arith.addf %120, %123 : vector<8x64xf32>
    %cst_47 = arith.constant 5.000000e-01 : f32
    %125 = vector.broadcast %cst_47 : f32 to vector<8x64xf32>
    %126 = arith.mulf %125, %124 : vector<8x64xf32>
    %cst_48 = arith.constant 4.471500e-02 : f32
    %127 = vector.broadcast %cst_48 : f32 to vector<8x64xf32>
    %128 = arith.mulf %127, %124 : vector<8x64xf32>
    %129 = arith.mulf %128, %124 : vector<8x64xf32>
    %130 = arith.mulf %129, %124 : vector<8x64xf32>
    %131 = arith.addf %124, %130 : vector<8x64xf32>
    %cst_49 = arith.constant 0.797884583 : f32
    %132 = vector.broadcast %cst_49 : f32 to vector<8x64xf32>
    %133 = arith.mulf %132, %131 : vector<8x64xf32>
    %134 = math.tanh %133 : vector<8x64xf32>
    %cst_50 = arith.constant 1.000000e+00 : f32
    %135 = vector.broadcast %cst_50 : f32 to vector<8x64xf32>
    %136 = arith.addf %135, %134 : vector<8x64xf32>
    %137 = arith.mulf %126, %136 : vector<8x64xf32>
    %138 = arith.truncf %137 : vector<8x64xf32> to vector<8x64xbf16>
    %c0_51 = arith.constant 0 : index
    %c0_52 = arith.constant 0 : index
    %c0_53 = arith.constant 0 : index
    %139 = vector.load %arg7[%c0_51, %c0_52, %c0_53] : memref<2x64x32xbf16, #tpu.memory_space<vmem>>, vector<1x64x32xbf16>
    %140 = vector.shape_cast %139 : vector<1x64x32xbf16> to vector<64x32xbf16>
    %cst_54 = arith.constant dense<0.000000e+00> : vector<8x32xf32>
    %141 = tpu.matmul %138, %140, %cst_54 {dimension_numbers = #tpu.dot_dimension_numbers<[1], [0], [0], [1], [0, 0, 1, 1], [], []>} : vector<8x64xbf16>, vector<64x32xbf16>, vector<8x32xf32> -> vector<8x32xf32>
    %142 = vector.broadcast %36 : vector<1x32xf32> to vector<8x32xf32>
    %143 = arith.addf %141, %142 : vector<8x32xf32>
    %144 = arith.addf %143, %116 : vector<8x32xf32>
    %cst_55 = arith.constant dense<0.000000e+00> : vector<8xf32>
    %145 = vector.multi_reduction <add>, %144, %cst_55 [1] : vector<8x32xf32> to vector<8xf32>
    %146 = vector.shape_cast %145 : vector<8xf32> to vector<8x1xf32>
    %cst_56 = arith.constant 3.200000e+01 : f32
    %147 = vector.broadcast %cst_56 : f32 to vector<8x1xf32>
    %148 = arith.divf %146, %147 : vector<8x1xf32>
    %149 = vector.broadcast %148 : vector<8x1xf32> to vector<8x32xf32>
    %150 = arith.subf %144, %149 : vector<8x32xf32>
    %151 = arith.mulf %150, %150 : vector<8x32xf32>
    %cst_57 = arith.constant dense<0.000000e+00> : vector<8xf32>
    %152 = vector.multi_reduction <add>, %151, %cst_57 [1] : vector<8x32xf32> to vector<8xf32>
    %153 = vector.shape_cast %152 : vector<8xf32> to vector<8x1xf32>
    %cst_58 = arith.constant 3.200000e+01 : f32
    %154 = vector.broadcast %cst_58 : f32 to vector<8x1xf32>
    %155 = arith.divf %153, %154 : vector<8x1xf32>
    %cst_59 = arith.constant 9.99999996E-13 : f32
    %156 = vector.broadcast %cst_59 : f32 to vector<8x1xf32>
    %157 = arith.addf %155, %156 : vector<8x1xf32>
    %158 = math.rsqrt %157 : vector<8x1xf32>
    %159 = vector.broadcast %158 : vector<8x1xf32> to vector<8x32xf32>
    %160 = arith.mulf %150, %159 : vector<8x32xf32>
    %161 = vector.broadcast %37 : vector<1x32xf32> to vector<8x32xf32>
    %162 = arith.mulf %160, %161 : vector<8x32xf32>
    %163 = vector.broadcast %38 : vector<1x32xf32> to vector<8x32xf32>
    %164 = arith.addf %162, %163 : vector<8x32xf32>
    %c1 = arith.constant 1 : index
    %c0_60 = arith.constant 0 : index
    %c0_61 = arith.constant 0 : index
    %165 = vector.load %arg10[%c1, %c0_60, %c0_61] : memref<2x6x32xf32, #tpu.memory_space<vmem>>, vector<1x6x32xf32>
    %166 = vector.shape_cast %165 : vector<1x6x32xf32> to vector<6x32xf32>
    %167 = vector.extract_strided_slice %166 {offsets = [0, 0], sizes = [1, 32], strides = [1, 1]} : vector<6x32xf32> to vector<1x32xf32>
    %168 = vector.extract_strided_slice %166 {offsets = [1, 0], sizes = [1, 32], strides = [1, 1]} : vector<6x32xf32> to vector<1x32xf32>
    %169 = vector.extract_strided_slice %166 {offsets = [2, 0], sizes = [1, 32], strides = [1, 1]} : vector<6x32xf32> to vector<1x32xf32>
    %170 = vector.extract_strided_slice %166 {offsets = [3, 0], sizes = [1, 32], strides = [1, 1]} : vector<6x32xf32> to vector<1x32xf32>
    %171 = vector.extract_strided_slice %166 {offsets = [4, 0], sizes = [1, 32], strides = [1, 1]} : vector<6x32xf32> to vector<1x32xf32>
    %172 = vector.extract_strided_slice %166 {offsets = [5, 0], sizes = [1, 32], strides = [1, 1]} : vector<6x32xf32> to vector<1x32xf32>
    %173 = arith.truncf %164 : vector<8x32xf32> to vector<8x32xbf16>
    %c1_62 = arith.constant 1 : index
    %c0_63 = arith.constant 0 : index
    %c0_64 = arith.constant 0 : index
    %174 = vector.load %arg4[%c1_62, %c0_63, %c0_64] : memref<2x32x96xbf16, #tpu.memory_space<vmem>>, vector<1x32x96xbf16>
    %175 = vector.shape_cast %174 : vector<1x32x96xbf16> to vector<32x96xbf16>
    %cst_65 = arith.constant dense<0.000000e+00> : vector<8x96xf32>
    %176 = tpu.matmul %173, %175, %cst_65 {dimension_numbers = #tpu.dot_dimension_numbers<[1], [0], [0], [1], [0, 0, 1, 1], [], []>} : vector<8x32xbf16>, vector<32x96xbf16>, vector<8x96xf32> -> vector<8x96xf32>
    %c1_66 = arith.constant 1 : index
    %c0_67 = arith.constant 0 : index
    %c0_68 = arith.constant 0 : index
    %177 = vector.load %arg8[%c1_66, %c0_67, %c0_68] : memref<2x1x96xf32, #tpu.memory_space<vmem>>, vector<1x1x96xf32>
    %178 = vector.shape_cast %177 : vector<1x1x96xf32> to vector<1x96xf32>
    %179 = vector.broadcast %178 : vector<1x96xf32> to vector<8x96xf32>
    %180 = arith.addf %176, %179 : vector<8x96xf32>
    %181 = vector.extract_strided_slice %180 {offsets = [0, 0], sizes = [8, 16], strides = [1, 1]} : vector<8x96xf32> to vector<8x16xf32>
    %182 = arith.truncf %181 : vector<8x16xf32> to vector<8x16xbf16>
    %183 = vector.extract_strided_slice %180 {offsets = [0, 32], sizes = [8, 16], strides = [1, 1]} : vector<8x96xf32> to vector<8x16xf32>
    %184 = arith.truncf %183 : vector<8x16xf32> to vector<8x16xbf16>
    %185 = vector.extract_strided_slice %180 {offsets = [0, 64], sizes = [8, 16], strides = [1, 1]} : vector<8x96xf32> to vector<8x16xf32>
    %186 = arith.truncf %185 : vector<8x16xf32> to vector<8x16xbf16>
    %cst_69 = arith.constant dense<0.000000e+00> : vector<8x8xf32>
    %187 = tpu.matmul %182, %184, %cst_69 {dimension_numbers = #tpu.dot_dimension_numbers<[1], [1], [0], [0], [0, 0, 1, 0], [], []>} : vector<8x16xbf16>, vector<8x16xbf16>, vector<8x8xf32> -> vector<8x8xf32>
    %188 = vector.broadcast %30 : vector<1x8xf32> to vector<8x8xf32>
    %189 = arith.addf %187, %188 : vector<8x8xf32>
    %cst_70 = arith.constant dense<0xFF800000> : vector<8xf32>
    %190 = vector.multi_reduction <maximumf>, %189, %cst_70 [1] : vector<8x8xf32> to vector<8xf32>
    %191 = vector.shape_cast %190 : vector<8xf32> to vector<8x1xf32>
    %192 = vector.broadcast %191 : vector<8x1xf32> to vector<8x8xf32>
    %193 = arith.subf %189, %192 : vector<8x8xf32>
    %194 = math.exp %193 : vector<8x8xf32>
    %cst_71 = arith.constant dense<0.000000e+00> : vector<8xf32>
    %195 = vector.multi_reduction <add>, %194, %cst_71 [1] : vector<8x8xf32> to vector<8xf32>
    %196 = vector.shape_cast %195 : vector<8xf32> to vector<8x1xf32>
    %197 = tpu.reciprocal %196 {approx = true} : vector<8x1xf32> -> vector<8x1xf32>
    %198 = vector.broadcast %197 : vector<8x1xf32> to vector<8x8xf32>
    %199 = arith.mulf %194, %198 : vector<8x8xf32>
    %200 = arith.truncf %199 : vector<8x8xf32> to vector<8x8xbf16>
    %cst_72 = arith.constant dense<0.000000e+00> : vector<8x16xf32>
    %201 = tpu.matmul %200, %186, %cst_72 {dimension_numbers = #tpu.dot_dimension_numbers<[1], [0], [0], [1], [0, 0, 1, 1], [], []>} : vector<8x8xbf16>, vector<8x16xbf16>, vector<8x16xf32> -> vector<8x16xf32>
    %202 = vector.extract_strided_slice %180 {offsets = [0, 16], sizes = [8, 16], strides = [1, 1]} : vector<8x96xf32> to vector<8x16xf32>
    %203 = arith.truncf %202 : vector<8x16xf32> to vector<8x16xbf16>
    %204 = vector.extract_strided_slice %180 {offsets = [0, 48], sizes = [8, 16], strides = [1, 1]} : vector<8x96xf32> to vector<8x16xf32>
    %205 = arith.truncf %204 : vector<8x16xf32> to vector<8x16xbf16>
    %206 = vector.extract_strided_slice %180 {offsets = [0, 80], sizes = [8, 16], strides = [1, 1]} : vector<8x96xf32> to vector<8x16xf32>
    %207 = arith.truncf %206 : vector<8x16xf32> to vector<8x16xbf16>
    %cst_73 = arith.constant dense<0.000000e+00> : vector<8x8xf32>
    %208 = tpu.matmul %203, %205, %cst_73 {dimension_numbers = #tpu.dot_dimension_numbers<[1], [1], [0], [0], [0, 0, 1, 0], [], []>} : vector<8x16xbf16>, vector<8x16xbf16>, vector<8x8xf32> -> vector<8x8xf32>
    %209 = vector.broadcast %30 : vector<1x8xf32> to vector<8x8xf32>
    %210 = arith.addf %208, %209 : vector<8x8xf32>
    %cst_74 = arith.constant dense<0xFF800000> : vector<8xf32>
    %211 = vector.multi_reduction <maximumf>, %210, %cst_74 [1] : vector<8x8xf32> to vector<8xf32>
    %212 = vector.shape_cast %211 : vector<8xf32> to vector<8x1xf32>
    %213 = vector.broadcast %212 : vector<8x1xf32> to vector<8x8xf32>
    %214 = arith.subf %210, %213 : vector<8x8xf32>
    %215 = math.exp %214 : vector<8x8xf32>
    %cst_75 = arith.constant dense<0.000000e+00> : vector<8xf32>
    %216 = vector.multi_reduction <add>, %215, %cst_75 [1] : vector<8x8xf32> to vector<8xf32>
    %217 = vector.shape_cast %216 : vector<8xf32> to vector<8x1xf32>
    %218 = tpu.reciprocal %217 {approx = true} : vector<8x1xf32> -> vector<8x1xf32>
    %219 = vector.broadcast %218 : vector<8x1xf32> to vector<8x8xf32>
    %220 = arith.mulf %215, %219 : vector<8x8xf32>
    %221 = arith.truncf %220 : vector<8x8xf32> to vector<8x8xbf16>
    %cst_76 = arith.constant dense<0.000000e+00> : vector<8x16xf32>
    %222 = tpu.matmul %221, %207, %cst_76 {dimension_numbers = #tpu.dot_dimension_numbers<[1], [0], [0], [1], [0, 0, 1, 1], [], []>} : vector<8x8xbf16>, vector<8x16xbf16>, vector<8x16xf32> -> vector<8x16xf32>
    %223 = tpu.concatenate %201, %222 in 1 : vector<8x16xf32>, vector<8x16xf32> -> vector<8x32xf32>
    %224 = arith.truncf %223 : vector<8x32xf32> to vector<8x32xbf16>
    %c1_77 = arith.constant 1 : index
    %c0_78 = arith.constant 0 : index
    %c0_79 = arith.constant 0 : index
    %225 = vector.load %arg5[%c1_77, %c0_78, %c0_79] : memref<2x32x32xbf16, #tpu.memory_space<vmem>>, vector<1x32x32xbf16>
    %226 = vector.shape_cast %225 : vector<1x32x32xbf16> to vector<32x32xbf16>
    %cst_80 = arith.constant dense<0.000000e+00> : vector<8x32xf32>
    %227 = tpu.matmul %224, %226, %cst_80 {dimension_numbers = #tpu.dot_dimension_numbers<[1], [0], [0], [1], [0, 0, 1, 1], [], []>} : vector<8x32xbf16>, vector<32x32xbf16>, vector<8x32xf32> -> vector<8x32xf32>
    %228 = vector.broadcast %167 : vector<1x32xf32> to vector<8x32xf32>
    %229 = arith.addf %227, %228 : vector<8x32xf32>
    %230 = arith.addf %229, %164 : vector<8x32xf32>
    %cst_81 = arith.constant dense<0.000000e+00> : vector<8xf32>
    %231 = vector.multi_reduction <add>, %230, %cst_81 [1] : vector<8x32xf32> to vector<8xf32>
    %232 = vector.shape_cast %231 : vector<8xf32> to vector<8x1xf32>
    %cst_82 = arith.constant 3.200000e+01 : f32
    %233 = vector.broadcast %cst_82 : f32 to vector<8x1xf32>
    %234 = arith.divf %232, %233 : vector<8x1xf32>
    %235 = vector.broadcast %234 : vector<8x1xf32> to vector<8x32xf32>
    %236 = arith.subf %230, %235 : vector<8x32xf32>
    %237 = arith.mulf %236, %236 : vector<8x32xf32>
    %cst_83 = arith.constant dense<0.000000e+00> : vector<8xf32>
    %238 = vector.multi_reduction <add>, %237, %cst_83 [1] : vector<8x32xf32> to vector<8xf32>
    %239 = vector.shape_cast %238 : vector<8xf32> to vector<8x1xf32>
    %cst_84 = arith.constant 3.200000e+01 : f32
    %240 = vector.broadcast %cst_84 : f32 to vector<8x1xf32>
    %241 = arith.divf %239, %240 : vector<8x1xf32>
    %cst_85 = arith.constant 9.99999996E-13 : f32
    %242 = vector.broadcast %cst_85 : f32 to vector<8x1xf32>
    %243 = arith.addf %241, %242 : vector<8x1xf32>
    %244 = math.rsqrt %243 : vector<8x1xf32>
    %245 = vector.broadcast %244 : vector<8x1xf32> to vector<8x32xf32>
    %246 = arith.mulf %236, %245 : vector<8x32xf32>
    %247 = vector.broadcast %168 : vector<1x32xf32> to vector<8x32xf32>
    %248 = arith.mulf %246, %247 : vector<8x32xf32>
    %249 = vector.broadcast %169 : vector<1x32xf32> to vector<8x32xf32>
    %250 = arith.addf %248, %249 : vector<8x32xf32>
    %251 = arith.truncf %250 : vector<8x32xf32> to vector<8x32xbf16>
    %c1_86 = arith.constant 1 : index
    %c0_87 = arith.constant 0 : index
    %c0_88 = arith.constant 0 : index
    %252 = vector.load %arg6[%c1_86, %c0_87, %c0_88] : memref<2x32x64xbf16, #tpu.memory_space<vmem>>, vector<1x32x64xbf16>
    %253 = vector.shape_cast %252 : vector<1x32x64xbf16> to vector<32x64xbf16>
    %cst_89 = arith.constant dense<0.000000e+00> : vector<8x64xf32>
    %254 = tpu.matmul %251, %253, %cst_89 {dimension_numbers = #tpu.dot_dimension_numbers<[1], [0], [0], [1], [0, 0, 1, 1], [], []>} : vector<8x32xbf16>, vector<32x64xbf16>, vector<8x64xf32> -> vector<8x64xf32>
    %c1_90 = arith.constant 1 : index
    %c0_91 = arith.constant 0 : index
    %c0_92 = arith.constant 0 : index
    %255 = vector.load %arg9[%c1_90, %c0_91, %c0_92] : memref<2x1x64xf32, #tpu.memory_space<vmem>>, vector<1x1x64xf32>
    %256 = vector.shape_cast %255 : vector<1x1x64xf32> to vector<1x64xf32>
    %257 = vector.broadcast %256 : vector<1x64xf32> to vector<8x64xf32>
    %258 = arith.addf %254, %257 : vector<8x64xf32>
    %cst_93 = arith.constant 5.000000e-01 : f32
    %259 = vector.broadcast %cst_93 : f32 to vector<8x64xf32>
    %260 = arith.mulf %259, %258 : vector<8x64xf32>
    %cst_94 = arith.constant 4.471500e-02 : f32
    %261 = vector.broadcast %cst_94 : f32 to vector<8x64xf32>
    %262 = arith.mulf %261, %258 : vector<8x64xf32>
    %263 = arith.mulf %262, %258 : vector<8x64xf32>
    %264 = arith.mulf %263, %258 : vector<8x64xf32>
    %265 = arith.addf %258, %264 : vector<8x64xf32>
    %cst_95 = arith.constant 0.797884583 : f32
    %266 = vector.broadcast %cst_95 : f32 to vector<8x64xf32>
    %267 = arith.mulf %266, %265 : vector<8x64xf32>
    %268 = math.tanh %267 : vector<8x64xf32>
    %cst_96 = arith.constant 1.000000e+00 : f32
    %269 = vector.broadcast %cst_96 : f32 to vector<8x64xf32>
    %270 = arith.addf %269, %268 : vector<8x64xf32>
    %271 = arith.mulf %260, %270 : vector<8x64xf32>
    %272 = arith.truncf %271 : vector<8x64xf32> to vector<8x64xbf16>
    %c1_97 = arith.constant 1 : index
    %c0_98 = arith.constant 0 : index
    %c0_99 = arith.constant 0 : index
    %273 = vector.load %arg7[%c1_97, %c0_98, %c0_99] : memref<2x64x32xbf16, #tpu.memory_space<vmem>>, vector<1x64x32xbf16>
    %274 = vector.shape_cast %273 : vector<1x64x32xbf16> to vector<64x32xbf16>
    %cst_100 = arith.constant dense<0.000000e+00> : vector<8x32xf32>
    %275 = tpu.matmul %272, %274, %cst_100 {dimension_numbers = #tpu.dot_dimension_numbers<[1], [0], [0], [1], [0, 0, 1, 1], [], []>} : vector<8x64xbf16>, vector<64x32xbf16>, vector<8x32xf32> -> vector<8x32xf32>
    %276 = vector.broadcast %170 : vector<1x32xf32> to vector<8x32xf32>
    %277 = arith.addf %275, %276 : vector<8x32xf32>
    %278 = arith.addf %277, %250 : vector<8x32xf32>
    %cst_101 = arith.constant dense<0.000000e+00> : vector<8xf32>
    %279 = vector.multi_reduction <add>, %278, %cst_101 [1] : vector<8x32xf32> to vector<8xf32>
    %280 = vector.shape_cast %279 : vector<8xf32> to vector<8x1xf32>
    %cst_102 = arith.constant 3.200000e+01 : f32
    %281 = vector.broadcast %cst_102 : f32 to vector<8x1xf32>
    %282 = arith.divf %280, %281 : vector<8x1xf32>
    %283 = vector.broadcast %282 : vector<8x1xf32> to vector<8x32xf32>
    %284 = arith.subf %278, %283 : vector<8x32xf32>
    %285 = arith.mulf %284, %284 : vector<8x32xf32>
    %cst_103 = arith.constant dense<0.000000e+00> : vector<8xf32>
    %286 = vector.multi_reduction <add>, %285, %cst_103 [1] : vector<8x32xf32> to vector<8xf32>
    %287 = vector.shape_cast %286 : vector<8xf32> to vector<8x1xf32>
    %cst_104 = arith.constant 3.200000e+01 : f32
    %288 = vector.broadcast %cst_104 : f32 to vector<8x1xf32>
    %289 = arith.divf %287, %288 : vector<8x1xf32>
    %cst_105 = arith.constant 9.99999996E-13 : f32
    %290 = vector.broadcast %cst_105 : f32 to vector<8x1xf32>
    %291 = arith.addf %289, %290 : vector<8x1xf32>
    %292 = math.rsqrt %291 : vector<8x1xf32>
    %293 = vector.broadcast %292 : vector<8x1xf32> to vector<8x32xf32>
    %294 = arith.mulf %284, %293 : vector<8x32xf32>
    %295 = vector.broadcast %171 : vector<1x32xf32> to vector<8x32xf32>
    %296 = arith.mulf %294, %295 : vector<8x32xf32>
    %297 = vector.broadcast %172 : vector<1x32xf32> to vector<8x32xf32>
    %298 = arith.addf %296, %297 : vector<8x32xf32>
    %299 = vector.extract_strided_slice %298 {offsets = [0, 0], sizes = [1, 32], strides = [1, 1]} : vector<8x32xf32> to vector<1x32xf32>
    %300 = arith.truncf %299 : vector<1x32xf32> to vector<1x32xbf16>
    %c0_106 = arith.constant 0 : index
    %c0_107 = arith.constant 0 : index
    %301 = vector.load %arg11[%c0_106, %c0_107] : memref<32x128xbf16, #tpu.memory_space<vmem>>, vector<32x128xbf16>
    %cst_108 = arith.constant dense<0.000000e+00> : vector<1x128xf32>
    %302 = tpu.matmul %300, %301, %cst_108 {dimension_numbers = #tpu.dot_dimension_numbers<[1], [0], [0], [1], [0, 0, 1, 1], [], []>} : vector<1x32xbf16>, vector<32x128xbf16>, vector<1x128xf32> -> vector<1x128xf32>
    %c0_109 = arith.constant 0 : index
    %c0_110 = arith.constant 0 : index
    %303 = vector.load %arg12[%c0_109, %c0_110] : memref<1x128xf32, #tpu.memory_space<vmem>>, vector<1x128xf32>
    %304 = arith.addf %302, %303 : vector<1x128xf32>
    %cst_111 = arith.constant 5.000000e-01 : f32
    %305 = vector.broadcast %cst_111 : f32 to vector<1x128xf32>
    %306 = arith.mulf %305, %304 : vector<1x128xf32>
    %cst_112 = arith.constant 4.471500e-02 : f32
    %307 = vector.broadcast %cst_112 : f32 to vector<1x128xf32>
    %308 = arith.mulf %307, %304 : vector<1x128xf32>
    %309 = arith.mulf %308, %304 : vector<1x128xf32>
    %310 = arith.mulf %309, %304 : vector<1x128xf32>
    %311 = arith.addf %304, %310 : vector<1x128xf32>
    %cst_113 = arith.constant 0.797884583 : f32
    %312 = vector.broadcast %cst_113 : f32 to vector<1x128xf32>
    %313 = arith.mulf %312, %311 : vector<1x128xf32>
    %314 = math.tanh %313 : vector<1x128xf32>
    %cst_114 = arith.constant 1.000000e+00 : f32
    %315 = vector.broadcast %cst_114 : f32 to vector<1x128xf32>
    %316 = arith.addf %315, %314 : vector<1x128xf32>
    %317 = arith.mulf %306, %316 : vector<1x128xf32>
    %c0_115 = arith.constant 0 : index
    %c0_116 = arith.constant 0 : index
    %c0_117 = arith.constant 0 : index
    %318 = vector.load %arg13[%c0_115, %c0_116, %c0_117] : memref<1x1x128xf32, #tpu.memory_space<vmem>>, vector<1x1x128xf32>
    %319 = vector.shape_cast %318 : vector<1x1x128xf32> to vector<1x128xf32>
    %320 = vector.shape_cast %317 : vector<1x128xf32> to vector<1x1x128xf32>
    tpu.vector_store %arg13[%c0_115, %c0_116, %c0_117], %320 {strides = array<i32>} : memref<1x1x128xf32, #tpu.memory_space<vmem>>, vector<1x1x128xf32>,
    return
  }
  func.func @transform_0(%arg0: i32) -> (i32, i32, i32) {
    %c0_i32 = arith.constant 0 : i32
    %c0_i32_0 = arith.constant 0 : i32
    %c0_i32_1 = arith.constant 0 : i32
    return %arg0, %c0_i32, %c0_i32_0 : i32, i32, i32
  }
  func.func @transform_1(%arg0: i32) -> (i32, i32, i32) {
    %c0_i32 = arith.constant 0 : i32
    %c0_i32_0 = arith.constant 0 : i32
    %c0_i32_1 = arith.constant 0 : i32
    return %arg0, %c0_i32, %c0_i32_0 : i32, i32, i32
  }
  func.func @transform_2(%arg0: i32) -> (i32, i32) {
    %c0_i32 = arith.constant 0 : i32
    %c0_i32_0 = arith.constant 0 : i32
    %c0_i32_1 = arith.constant 0 : i32
    return %c0_i32, %c0_i32_0 : i32, i32
  }
  func.func @transform_3(%arg0: i32) -> (i32, i32, i32) {
    %c0_i32 = arith.constant 0 : i32
    %c0_i32_0 = arith.constant 0 : i32
    %c0_i32_1 = arith.constant 0 : i32
    %c0_i32_2 = arith.constant 0 : i32
    return %c0_i32, %c0_i32_0, %c0_i32_1 : i32, i32, i32
  }
  func.func @transform_4(%arg0: i32) -> (i32, i32, i32) {
    %c0_i32 = arith.constant 0 : i32
    %c0_i32_0 = arith.constant 0 : i32
    %c0_i32_1 = arith.constant 0 : i32
    %c0_i32_2 = arith.constant 0 : i32
    return %c0_i32, %c0_i32_0, %c0_i32_1 : i32, i32, i32
  }
  func.func @transform_5(%arg0: i32) -> (i32, i32, i32) {
    %c0_i32 = arith.constant 0 : i32
    %c0_i32_0 = arith.constant 0 : i32
    %c0_i32_1 = arith.constant 0 : i32
    %c0_i32_2 = arith.constant 0 : i32
    return %c0_i32, %c0_i32_0, %c0_i32_1 : i32, i32, i32
  }
  func.func @transform_6(%arg0: i32) -> (i32, i32, i32) {
    %c0_i32 = arith.constant 0 : i32
    %c0_i32_0 = arith.constant 0 : i32
    %c0_i32_1 = arith.constant 0 : i32
    %c0_i32_2 = arith.constant 0 : i32
    return %c0_i32, %c0_i32_0, %c0_i32_1 : i32, i32, i32
  }
  func.func @transform_7(%arg0: i32) -> (i32, i32, i32) {
    %c0_i32 = arith.constant 0 : i32
    %c0_i32_0 = arith.constant 0 : i32
    %c0_i32_1 = arith.constant 0 : i32
    %c0_i32_2 = arith.constant 0 : i32
    return %c0_i32, %c0_i32_0, %c0_i32_1 : i32, i32, i32
  }
  func.func @transform_8(%arg0: i32) -> (i32, i32, i32) {
    %c0_i32 = arith.constant 0 : i32
    %c0_i32_0 = arith.constant 0 : i32
    %c0_i32_1 = arith.constant 0 : i32
    %c0_i32_2 = arith.constant 0 : i32
    return %c0_i32, %c0_i32_0, %c0_i32_1 : i32, i32, i32
  }
  func.func @transform_9(%arg0: i32) -> (i32, i32, i32) {
    %c0_i32 = arith.constant 0 : i32
    %c0_i32_0 = arith.constant 0 : i32
    %c0_i32_1 = arith.constant 0 : i32
    %c0_i32_2 = arith.constant 0 : i32
    return %c0_i32, %c0_i32_0, %c0_i32_1 : i32, i32, i32
  }
  func.func @transform_10(%arg0: i32) -> (i32, i32) {
    %c0_i32 = arith.constant 0 : i32
    %c0_i32_0 = arith.constant 0 : i32
    %c0_i32_1 = arith.constant 0 : i32
    return %c0_i32, %c0_i32_0 : i32, i32
  }
  func.func @transform_11(%arg0: i32) -> (i32, i32) {
    %c0_i32 = arith.constant 0 : i32
    %c0_i32_0 = arith.constant 0 : i32
    %c0_i32_1 = arith.constant 0 : i32
    return %c0_i32, %c0_i32_0 : i32, i32
  }
  func.func @transform_12(%arg0: i32) -> (i32, i32, i32) {
    %c0_i32 = arith.constant 0 : i32
    %c0_i32_0 = arith.constant 0 : i32
    %c0_i32_1 = arith.constant 0 : i32
    return %arg0, %c0_i32, %c0_i32_0 : i32, i32, i32
  }
}

</mosaic_0001>

<bundles_post_ra>
// kernel: bert_encoder_forward.1
= control target key start
LH: loop header
LB: loop body
LE: loop exit
PB: predicated region body
PF: predicated region fallthrough
CT: control target
= control target key end

     0   :  { %s1935_s0 = inlined_call_operand.vmem [shape: f32[2,8,32], index: 0, kind: input, shape index: {}]   ;;  %s1936_s1 = inlined_call_operand.vmem [shape: f32[2,1,8], index: 1, kind: input, shape index: {}]   ;;  %s1937_s2 = inlined_call_operand.vmem [shape: f32[2,32], index: 2, kind: input, shape index: {}]   ;;  %s1938_s3 = inlined_call_operand.vmem [shape: bf16[2,32,96], index: 3, kind: input, shape index: {}]   ;;  %s1939_s4 = inlined_call_operand.vmem [shape: bf16[2,32,32], index: 4, kind: input, shape index: {}]   ;;  %s1940_s5 = inlined_call_operand.vmem [shape: bf16[2,32,64], index: 5, kind: input, shape index: {}]   ;;  %s1941_s6 = inlined_call_operand.vmem [shape: bf16[2,64,32], index: 6, kind: input, shape index: {}]   ;;  %s1942_s7 = inlined_call_operand.vmem [shape: f32[2,1,96], index: 7, kind: input, shape index: {}]   ;;  %s1943_s8 = inlined_call_operand.vmem [shape: f32[2,1,64], index: 8, kind: input, shape index: {}]   ;;  %s1944_s9 = inlined_call_operand.vmem [shape: f32[2,6,32], index: 9, kind: input, shape index: {}]   ;;  %s1945_s10 = inlined_call_operand.vmem [shape: bf16[32,128], index: 10, kind: input, shape index: {}]   ;;  %s1946_s11 = inlined_call_operand.vmem [shape: f32[1,128], index: 11, kind: input, shape index: {}]   ;;  %s1947_s12 = inlined_call_operand.hbm [shape: f32[2,1,128], index: 12, kind: output, shape index: {}]  }
   0x1   :  { %1954 = sst [smem:[#allocation5_spill]] %s1935_s0 }
   0x2   :  { %1955 = sst [smem:[#allocation6_spill]] %s1936_s1 }
   0x3   :  { %17 = vsyncpa [#allocation3], 0 }
   0x4   :  { %19 = vsyncpa [#allocation3 + $0x1], 0  ;;  %s1652_s21 = smov 0   ;;  %s1654_s22 = smov 0  }
   0x5   :  { %s1656_s23 = smov 0   ;;  %s1658_s24 = smov 0  }
   0x6 LB: > { %s1673_s25 = sadd.s32 4294967295, %s1578_s24   ;;  %s1275_s26 = sadd.s32 4294967294, %s1578_s24   ;;  %s1578_s24 = sphi %s1658_s24, %s1969_s24   ;;  %s1574_s23 = sphi %s1656_s23, %s1968_s23   ;;  %s1570_s22 = sphi %s1654_s22, %s1967_s22   ;;  %s1566_s21 = sphi %s1652_s21, %s1966_s21  }
   0x7   : > { %s1677_s27 = sadd.s32 1, %s1578_s24   ;;  %s294_s28 = sadd.s32 1, %s1574_s23 }
   0x8   : > { %s291_s29 = ssub.s32 %s1578_s24, %s1677_s27  ;;  %p304_p0 = scmp.ne.s32.totalorder %s1574_s23, %s1570_s22 }
   0x9   : > { %p292_p1 = scmp.eq.s32.totalorder %s291_s29, 0  ;;  %p305_p2 = scmp.eq.s32.totalorder %s1673_s25, 1 }
   0xa   : > { %p310_p3 = scmp.ne.s32.totalorder %s1570_s22, %s1566_s21  ;;  %p311_p4 = scmp.eq.s32.totalorder %s1275_s26, 1 }
   0xb   : > { %s1688_s30 = scalar_select %p292_p1, %s1574_s23, %s294_s28  }
   0xc   : > { %p1690_p5 = por %p305_p2, %p304_p0  ;;  %p1694_p6 = por %p311_p4, %p310_p3 }
   0xd   : > { %p1278_p7 = scmp.ge.s32.totalorder %s1578_s24, 1  ;;  %p372_p8 = scmp.lt.s32.totalorder %s1578_s24, 3 }
   0xf   : > { %p373_p9 = pnand %p1278_p7, %p372_p8 }
  0x10   : > { %p415_p10 = scmp.lt.s32.totalorder (!%p373_p9), %s1673_s25, 1  ;;  %s1958_s0 = sld [smem:[#allocation5_spill]] (!%p373_p9) }
  0x11   : > { %376 = sbr.rel (%p373_p9) target bundleno = 4171 (0x104b), region = 68  ;;  %s1953_s20 = smov (!%p373_p9), 112  }
  0x12   : > { %s1950_s26 = smov (!%p373_p9), 96   ;;  %s1952_s28 = smov (!%p373_p9), 80  }
  0x13   : > { %s1959_s1 = sld [smem:[#allocation6_spill]] (!%p373_p9)  ;;  %s1948_s18 = smov (!%p373_p9), 64  }
  0x14   : > { %s1963_s29 = smov (!%p373_p9), 96  }
  0x16   : > { %s1702_s15 = scalar_select %p415_p10, %s1673_s25, 1  ;;  %vm425_vm0 = vcmask 261120   ;;  %v1580_v2 = vmov 32.0   ;;  %v1411_v14 = vld [vmem:[%s1938_s3 + $0x8] sm:$0xff]  ;;  %v1410_v15 = vld [vmem:[%s1938_s3] sm:$0xff]  ;;  %vm507_vm5 = vcmask 130048  }
  0x17   : > { %1482 = vrcp.f32 %v1580_v2  ;;  %493 = vmatpush.bf16.msra.mxu0 %v1411_v14  ;;  %v423_v24 = vld [vmem:[%s1937_s2] sm:$0x3]  ;;  %vm527_vm6 = vcmask 64512   ;;  %vm545_vm7 = vcmask 1043456   ;;  %v1413_v14 = vld [vmem:[%s1939_s4 + $0x8] sm:$0xff]  ;;  %vm764_vm11 = vcmask 523264  }
  0x18   : > { %s1279_s16 = sshll.u32 %s1702_s15, 3  ;;  %v455_v26 = vperm.slane %v423_v24, 0  ;;  %v457_v29 = vperm.slane %v423_v24, 1  ;;  %v1478_v33 = vld [vmem:[%s1942_s7] ss:$0 sm:$0xff] }
  0x19   : > { %s418_s19 = scalar_lea.vmem %s1958_s0, %s1279_s16  ;;  %s421_s17 = scalar_lea.vmem %s1959_s1, %s1702_s15 }
  0x1a   : > { %v424_v0 = vld [vmem:[%s418_s19] sm:$0xff]  ;;  %s1951_s15 = smov 48   ;;  %s1949_s16 = smov 16  }
  0x1b   : > { %v426_v1 = vsel %vm425_vm0, %v424_v0, 0.0  ;;  %494 = vmatpush.bf16.msra.mxu0 %v1410_v15  ;;  %v459_v43 = vld [vmem:[%s421_s17] sm:$0x1]  ;;  %s1961_s17 = smov 80   ;;  %s1962_s19 = smov 48  }
  0x1c   : > { %427 = vadd.xlane.f32.xlu0 %v426_v1  ;;  %v460_v44 = vsub.f32 1.0, %v459_v43  ;;  %s1964_s0 = smov 64  }
  0x1d   : > { %v1483_v3 = vpop.eup %1482 }
  0x1e   : > { %v430_v4 = vmul.f32 32.0, %v1483_v3  ;;  %vm434_vm1 = vweird.f32 %v1483_v3  ;;  %v461_v45 = vmul.f32 -1e+09, %v460_v44 }
  0x1f   : > { %650 = vmatpush.bf16.msrb.mxu0 %v1413_v14 }
  0x20   : > { %v431_v5 = vsub.f32 1.0, %v430_v4  ;;  %v1742_v46 = vperm.slane %v461_v45, 0 }
  0x22   : > { %v432_v6 = vmul.f32 %v1483_v3, %v431_v5 }
  0x24   : > { %v433_v7 = vadd.f32 %v1483_v3, %v432_v6 }
  0x26   : > { %v1709_v8 = vsel %vm434_vm1, %v1483_v3, %v433_v7 }
  0x8f   : > { %v428_v9 = vpop.xlane.xlu0 %427 }
  0x90   : > { %v436_v10 = vmul.f32 %v1709_v8, %v428_v9 }
  0x92   : > { %v437_v11 = vsub.f32 %v424_v0, %v436_v10 }
  0x94   : > { %v438_v12 = vmul.f32 %v437_v11, %v437_v11 }
  0x96   : > { %v439_v13 = vsel %vm425_vm0, %v438_v12, 0.0 }
  0x97   : > { %440 = vadd.xlane.f32.xlu0 %v439_v13 }
 0x10a   : > { %v441_v16 = vpop.xlane.xlu0 %440 }
 0x10b   : > { %v442_v17 = vmul.f32 %v441_v16, %v1709_v8 }
 0x10d   : > { %v443_v18 = vadd.f32 1e-12, %v442_v17 }
 0x10f   : > { %1484 = vrsqrt.f32 %v443_v18  ;;  %vm450_vm3 = vweird.f32 %v443_v18 }
 0x115   : > { %v1485_v19 = vpop.eup %1484 }
 0x116   : > { %v445_v20 = vmul.f32 %v1485_v19, %v443_v18  ;;  %vm451_vm2 = vweird.f32 %v1485_v19 }
 0x117   : > { %vm452_vm4 = vmor %vm450_vm3, %vm451_vm2 }
 0x118   : > { %v446_v21 = vmul.f32 %v1485_v19, %v445_v20 }
 0x11a   : > { %v447_v22 = vmul.f32 0.5, %v446_v21 }
 0x11c   : > { %v448_v23 = vsub.f32 1.5, %v447_v22 }
 0x11e   : > { %v449_v25 = vmul.f32 %v1485_v19, %v448_v23  ;;  %v1768_v23 = vld [vmem:[%s1944_s9] sm:$0x3f] }
 0x11f   : > { %v628_v24 = vperm.slane %v1768_v23, 0 }
 0x120   : > { %v453_v27 = vsel %vm452_vm4, %v1485_v19, %v449_v25  ;;  %v1412_v19 = vld [vmem:[%s1939_s4] sm:$0xff] }
 0x121   : > { %v454_v28 = vmul.f32 %v453_v27, %v437_v11  ;;  %651 = vmatpush.bf16.msrb.mxu0 %v1412_v19 }
 0x123   : > { %v456_v30 = vmul.f32 %v455_v26, %v454_v28 }
 0x125   : > { %v1723_v31 = vadd.f32 %v457_v29, %v456_v30 }
 0x127   : > { %v463_v32 = vpack.c.bf16 %v1723_v31, %v1723_v31 }
 0x129   : > { %1288 = vmatmul.msk.bf16.vlgmr.msra.gmra.mxu0 %vm425_vm0, %v463_v32 }
 0x1a6   : > { %v496_v34 = vpop.f32.mrf.mxu0 }
 0x1a7   : > { %v497_v35 = vadd.f32 %v1478_v33, %v496_v34 }
 0x1a9   : > { %v500_v36 = vpack.c.bf16 %v497_v35, %v497_v35 }
 0x1ab   : > { %562 = vrot.lane.b32.xlu2 %v500_v36, %s1953_s20  ;;  %505 = vrot.lane.b32.xlu1 %v500_v36, %s1950_s26  ;;  %s1207_s20 = scalar_lea.hbm %s1947_s12, %s1673_s25 }
 0x1ae   : > { %v498_v37 = vpop.f32.mrf.mxu0 }
 0x1b3   : > { %564 = vrot.lane.b32.xlu1 %v500_v36, %s1952_s28  ;;  %s1965_s28 = smov 16  }
 0x205   : > { %v563_v42 = vpop.permute.xlu2 %562 }
 0x21d   : > { %v506_v38 = vpop.permute.xlu1 %505 }
 0x21e   : > { %v512_v39 = vsel %vm507_vm5, %v506_v38, 0 }
 0x21f   : > { %521 = vmatpush.bf16.xpose.msra.mxu1 %v512_v39 }
 0x225   : > { %v565_v40 = vpop.permute.xlu1 %564 }
 0x226   : > { %1289 = vmatmul.msk.bf16.vlgmr.msra.gmra.mxu1 %vm507_vm5, %v500_v36  ;;  %v570_v41 = vsel %vm507_vm5, %v565_v40, 0 }
 0x227   : > { %579 = vmatpush.bf16.xpose.msra.mxu3 %v570_v41 }
 0x22e   : > { %1291 = vmatmul.msk.bf16.vlgmr.msra.gmra.mxu3 %vm507_vm5, %v563_v42 }
 0x2a3   : > { %v523_v47 = vpop.f32.mrf.mxu1 }
 0x2a4   : > { %v524_v48 = vadd.f32 %v523_v47, %v1742_v46  ;;  %v680_v47 = vperm.slane %v1768_v23, 1 }
 0x2a6   : > { %v528_v49 = vsel %vm527_vm6, %v524_v48, -inf }
 0x2a7   : > { %529 = vmax.xlane.f32.xlu2 %v528_v49 }
 0x2ab   : > { %v525_v50 = vpop.f32.mrf.mxu1 }
 0x2ac   : > { %v682_v50 = vperm.slane %v1768_v23, 2 }
 0x2b1   : > { %v581_v51 = vpop.f32.mrf.mxu3 }
 0x2b2   : > { %v582_v52 = vadd.f32 %v581_v51, %v1742_v46 }
 0x2b4   : > { %v585_v53 = vsel %vm527_vm6, %v582_v52, -inf }
 0x2b5   : > { %586 = vmax.xlane.f32.xlu0 %v585_v53 }
 0x2b9   : > { %v583_v54 = vpop.f32.mrf.mxu3 }
 0x2ba   : > { %v1419_v54 = vld [vmem:[%s1941_s6 + $0x18] sm:$0xff] }
 0x2bb   : > { %772 = vmatpush.bf16.msrb.mxu3 %v1419_v54 }
 0x2bf   : > { %597 = vrot.lane.b32.xlu2 %v500_v36, %s1951_s15  ;;  %s1211_s15 = sshll.u32 %s1207_s20, 4  ;;  %s1212_s15 = int_to_ptr.hbm [resolvable:$true] %s1211_s15 }
 0x2c9   : > { %540 = vrot.lane.b32.xlu0 %v500_v36, %s1948_s18  ;;  %v1415_v36 = vld [vmem:[%s1940_s5 + $0x8] sm:$0xff]  ;;  %s1960_s18 = smov 112  }
 0x2ca   : > { %714 = vmatpush.bf16.msrb.mxu1 %v1415_v36 }
 0x31a   : > { %v530_v55 = vpop.xlane.xlu2 %529 }
 0x31b   : > { %v531_v56 = vsub.f32 %v524_v48, %v530_v55  ;;  %v1418_v55 = vld [vmem:[%s1941_s6 + $0x10] sm:$0xff] }
 0x31c   : > { %773 = vmatpush.bf16.msrb.mxu3 %v1418_v55 }
 0x31d   : > { %v532_v57 = vmul.f32 1.442695, %v531_v56  ;;  %v1417_v56 = vld [vmem:[%s1941_s6 + $0x8] sm:$0xff] }
 0x31f   : > { %1486 = vpow2.f32 %v532_v57  ;;  %v1416_v57 = vld [vmem:[%s1941_s6] sm:$0xff] }
 0x320   : > { %774 = vmatpush.bf16.msrb.mxu3 %v1417_v56 }
 0x322   : > { %v598_v1 = vpop.permute.xlu2 %597 }
 0x323   : > { %v603_v4 = vsel %vm545_vm7, %v598_v1, 0 }
 0x324   : > { %775 = vmatpush.bf16.msrb.mxu3 %v1416_v57 }
 0x325   : > { %v1487_v58 = vpop.eup %1486 }
 0x326   : > { %v534_v59 = vsel %vm527_vm6, %v1487_v58, 0.0 }
 0x327   : > { %535 = vadd.xlane.f32.xlu1 %v534_v59 }
 0x328   : > { %v587_v60 = vpop.xlane.xlu0 %586 }
 0x329   : > { %v588_v61 = vsub.f32 %v582_v52, %v587_v60 }
 0x32b   : > { %v589_v62 = vmul.f32 1.442695, %v588_v61 }
 0x32d   : > { %1488 = vpow2.f32 %v589_v62 }
 0x333   : > { %v1489_v63 = vpop.eup %1488 }
 0x334   : > { %v591_v0 = vsel %vm527_vm6, %v1489_v63, 0.0 }
 0x335   : > { %592 = vadd.xlane.f32.xlu0 %v591_v0 }
 0x33b   : > { %v541_v2 = vpop.permute.xlu0 %540 }
 0x33c   : > { %v547_v3 = vsel %vm545_vm7, %v541_v2, 0 }
 0x33d   : > { %556 = vmatpush.bf16.msra.mxu2 %v547_v3 }
 0x341   : > { %612 = vmatpush.bf16.msrb.mxu2 %v603_v4 }
 0x39a   : > { %v536_v5 = vpop.xlane.xlu1 %535 }
 0x39b   : > { %1490 = vrcp.f32 %v536_v5 }
 0x3a1   : > { %v1491_v6 = vpop.eup %1490 }
 0x3a2   : > { %v538_v7 = vmul.f32 %v1491_v6, %v1487_v58  ;;  %v1479_v58 = vld [vmem:[%s1943_s8] ss:$0 sm:$0xff] }
 0x3a4   : > { %v539_v9 = vpack.c.bf16 %v538_v7, %v538_v7 }
 0x3a6   : > { %1290 = vmatmul.msk.bf16.vlgmr.msra.gmra.mxu2 %vm527_vm6, %v539_v9  ;;  %v739_v9 = vperm.slane %v1768_v23, 3 }
 0x3a8   : > { %v593_v10 = vpop.xlane.xlu0 %592 }
 0x3a9   : > { %1492 = vrcp.f32 %v593_v10 }
 0x3af   : > { %v1493_v11 = vpop.eup %1492 }
 0x3b0   : > { %v595_v12 = vmul.f32 %v1493_v11, %v1489_v63 }
 0x3b2   : > { %v596_v13 = vpack.c.bf16 %v595_v12, %v595_v12 }
 0x3b6   : > { %1292 = vmatmul.msk.bf16.vlgmr.msrb.gmra.mxu2 %vm527_vm6, %v596_v13 }
 0x429   : > { %v558_v15 = vpop.f32.mrf.mxu2 }
 0x431   : > { %v560_v16 = vpop.f32.mrf.mxu2 }
 0x439   : > { %v614_v17 = vpop.f32.mrf.mxu2 }
 0x43a   : > { %619 = vrot.lane.b32.xlu1 %v614_v17, %s1949_s16 }
 0x441   : > { %v616_v18 = vpop.f32.mrf.mxu2 }
 0x4ac   : > { %v620_v20 = vpop.permute.xlu1 %619 }
 0x4ad   : > { %v622_v21 = vsel %vm507_vm5, %v558_v15, %v620_v20  ;;  %v1421_v20 = vld [vmem:[%s1938_s3 + $0x18] sm:$0xff] }
 0x4ae   : > { %v623_v22 = vpack.c.bf16 %v622_v21, %v622_v21  ;;  %842 = vmatpush.bf16.msra.mxu2 %v1421_v20  ;;  %v1420_v21 = vld [vmem:[%s1938_s3 + $0x10] sm:$0xff] }
 0x4af   : > { %v1422_v20 = vld [vmem:[%s1939_s4 + $0x10] sm:$0xff] }
 0x4b0   : > { %1301 = vmatmul.msk.bf16.vlgmr.msrb.gmra.mxu0 %vm425_vm0, %v623_v22 }
 0x4b2   : > { %843 = vmatpush.bf16.msra.mxu2 %v1420_v21 }
 0x52d   : > { %v653_v25 = vpop.f32.mrf.mxu0 }
 0x52e   : > { %v654_v26 = vadd.f32 %v653_v25, %v628_v24 }
 0x530   : > { %v657_v27 = vadd.f32 %v654_v26, %v1723_v31  ;;  %v1414_v31 = vld [vmem:[%s1940_s5] sm:$0xff] }
 0x531   : > { %715 = vmatpush.bf16.msrb.mxu1 %v1414_v31 }
 0x532   : > { %v658_v28 = vsel %vm425_vm0, %v657_v27, 0.0 }
 0x533   : > { %659 = vadd.xlane.f32.xlu2 %v658_v28 }
 0x535   : > { %v655_v29 = vpop.f32.mrf.mxu0 }
 0x5a6   : > { %v660_v30 = vpop.xlane.xlu2 %659 }
 0x5a7   : > { %v661_v32 = vmul.f32 %v660_v30, %v1709_v8 }
 0x5a9   : > { %v662_v33 = vsub.f32 %v657_v27, %v661_v32 }
 0x5ab   : > { %v663_v34 = vmul.f32 %v662_v33, %v662_v33 }
 0x5ad   : > { %v664_v35 = vsel %vm425_vm0, %v663_v34, 0.0 }
 0x5ae   : > { %665 = vadd.xlane.f32.xlu1 %v664_v35  ;;  %v806_v35 = vperm.slane %v1768_v23, 5 }
 0x621   : > { %v666_v37 = vpop.xlane.xlu1 %665 }
 0x622   : > { %v667_v38 = vmul.f32 %v666_v37, %v1709_v8 }
 0x624   : > { %v668_v39 = vadd.f32 1e-12, %v667_v38 }
 0x626   : > { %1494 = vrsqrt.f32 %v668_v39  ;;  %vm675_vm9 = vweird.f32 %v668_v39 }
 0x62c   : > { %v1495_v40 = vpop.eup %1494 }
 0x62d   : > { %v670_v41 = vmul.f32 %v1495_v40, %v668_v39  ;;  %vm676_vm8 = vweird.f32 %v1495_v40  ;;  %v1480_v39 = vld [vmem:[%s1942_s7 + $0x1] ss:$0 sm:$0xff] }
 0x62e   : > { %vm677_vm10 = vmor %vm675_vm9, %vm676_vm8 }
 0x62f   : > { %v671_v42 = vmul.f32 %v1495_v40, %v670_v41 }
 0x631   : > { %v672_v43 = vmul.f32 0.5, %v671_v42 }
 0x633   : > { %v673_v44 = vsub.f32 1.5, %v672_v43 }
 0x635   : > { %v674_v45 = vmul.f32 %v1495_v40, %v673_v44 }
 0x637   : > { %v678_v48 = vsel %vm677_vm10, %v1495_v40, %v674_v45 }
 0x638   : > { %v679_v49 = vmul.f32 %v678_v48, %v662_v33  ;;  %v804_v33 = vperm.slane %v1768_v23, 4 }
 0x63a   : > { %v681_v51 = vmul.f32 %v680_v47, %v679_v49 }
 0x63c   : > { %v683_v52 = vadd.f32 %v682_v50, %v681_v51 }
 0x63e   : > { %v684_v53 = vpack.c.bf16 %v683_v52, %v683_v52 }
 0x640   : > { %1310 = vmatmul.msk.bf16.vlgmr.msrb.gmra.mxu1 %vm425_vm0, %v684_v53 }
 0x6bd   : > { %v717_v59 = vpop.f32.mrf.mxu1 }
 0x6be   : > { %v718_v60 = vadd.f32 %v1479_v58, %v717_v59 }
 0x6c0   : > { %v722_v61 = vmul.f32 0.044715, %v718_v60  ;;  %v721_v4 = vmul.f32 0.5, %v718_v60 }
 0x6c2   : > { %v723_v62 = vmul.f32 %v722_v61, %v718_v60 }
 0x6c4   : > { %v724_v63 = vmul.f32 %v723_v62, %v718_v60 }
 0x6c5   : > { %v719_v0 = vpop.f32.mrf.mxu1 }
 0x6c6   : > { %v725_v1 = vadd.f32 %v724_v63, %v718_v60 }
 0x6c8   : > { %v726_v2 = vmul.f32 0.7978846, %v725_v1 }
 0x6ca   : > { %1496 = vtanh.f32 %v726_v2 }
 0x6d0   : > { %v1497_v3 = vpop.eup %1496 }
 0x6d1   : > { %v728_v5 = vadd.f32 1.0, %v1497_v3 }
 0x6d3   : > { %v729_v6 = vmul.f32 %v728_v5, %v721_v4 }
 0x6d5   : > { %v730_v7 = vpack.c.bf16 %v729_v6, %v729_v6 }
 0x6d7   : > { %1327 = vmatmul.msk.bf16.vlgmr.msrb.gmra.mxu3 %vm764_vm11, %v730_v7 }
 0x75a   : > { %v777_v10 = vpop.f32.mrf.mxu3 }
 0x75b   : > { %v778_v11 = vadd.f32 %v777_v10, %v739_v9 }
 0x75d   : > { %v781_v12 = vadd.f32 %v778_v11, %v683_v52 }
 0x75f   : > { %v782_v13 = vsel %vm425_vm0, %v781_v12, 0.0 }
 0x760   : > { %783 = vadd.xlane.f32.xlu0 %v782_v13 }
 0x762   : > { %v779_v14 = vpop.f32.mrf.mxu3 }
 0x7d3   : > { %v784_v15 = vpop.xlane.xlu0 %783 }
 0x7d4   : > { %v785_v16 = vmul.f32 %v784_v15, %v1709_v8  ;;  %v1423_v15 = vld [vmem:[%s1939_s4 + $0x18] sm:$0xff] }
 0x7d6   : > { %v786_v17 = vsub.f32 %v781_v12, %v785_v16 }
 0x7d8   : > { %v787_v18 = vmul.f32 %v786_v17, %v786_v17 }
 0x7da   : > { %v788_v19 = vsel %vm425_vm0, %v787_v18, 0.0 }
 0x7db   : > { %789 = vadd.xlane.f32.xlu0 %v788_v19 }
 0x84e   : > { %v790_v22 = vpop.xlane.xlu0 %789 }
 0x84f   : > { %v791_v24 = vmul.f32 %v790_v22, %v1709_v8 }
 0x851   : > { %v792_v25 = vadd.f32 1e-12, %v791_v24 }
 0x853   : > { %1498 = vrsqrt.f32 %v792_v25  ;;  %vm799_vm13 = vweird.f32 %v792_v25 }
 0x859   : > { %v1499_v26 = vpop.eup %1498 }
 0x85a   : > { %v794_v27 = vmul.f32 %v1499_v26, %v792_v25  ;;  %vm800_vm12 = vweird.f32 %v1499_v26  ;;  %v1853_v25 = vld [vmem:[%s1944_s9 + $0x8] sm:$0x3f] }
 0x85b   : > { %vm801_vm14 = vmor %vm799_vm13, %vm800_vm12 }
 0x85c   : > { %v795_v28 = vmul.f32 %v1499_v26, %v794_v27 }
 0x85e   : > { %v796_v29 = vmul.f32 0.5, %v795_v28 }
 0x860   : > { %v797_v30 = vsub.f32 1.5, %v796_v29 }
 0x862   : > { %v798_v32 = vmul.f32 %v1499_v26, %v797_v30 }
 0x864   : > { %v802_v34 = vsel %vm801_vm14, %v1499_v26, %v798_v32  ;;  %v972_v26 = vperm.slane %v1853_v25, 0 }
 0x865   : > { %v803_v36 = vmul.f32 %v802_v34, %v786_v17 }
 0x867   : > { %v805_v31 = vmul.f32 %v804_v33, %v803_v36 }
 0x869   : > { %v1814_v37 = vadd.f32 %v806_v35, %v805_v31 }
 0x86b   : > { %v810_v38 = vpack.c.bf16 %v1814_v37, %v1814_v37 }
 0x86d   : > { %1342 = vmatmul.msk.bf16.vlgmr.msra.gmra.mxu2 %vm425_vm0, %v810_v38  ;;  %v1425_v38 = vld [vmem:[%s1940_s5 + $0x18] sm:$0xff] }
 0x8f0   : > { %v845_v40 = vpop.f32.mrf.mxu2 }
 0x8f1   : > { %v846_v41 = vadd.f32 %v1480_v39, %v845_v40 }
 0x8f3   : > { %v849_v42 = vpack.c.bf16 %v846_v41, %v846_v41 }
 0x8f5   : > { %905 = vrot.lane.b32.xlu2 %v849_v42, %s1960_s18  ;;  %907 = vrot.lane.b32.xlu0 %v849_v42, %s1961_s17  ;;  %s1530_s18 = sshra.s32 %s1212_s15, 4  ;;  %s1531_s18 = int_to_ptr.hbm [resolvable:$true] %s1530_s18 }
 0x8f6   : > { %s1532_s17 = scalar_lea.hbm %s1531_s18, 1  ;;  %p1537_p0 = scmp.lt.s32.totalorder %s1531_s18, %s1947_s12 }
 0x8f7   : > { %p1533_p11 = scmp.ne.s32.totalorder %s1531_s18, %s1532_s17 }
 0x8f8   : > { %v847_v23 = vpop.f32.mrf.mxu2 }
 0x8f9   : > { %p1534_p12 = pnand %p1533_p11, %p1690_p5 }
 0x8fb   : > { %p1535_p13 = pneg %p1534_p12 }
 0x8fd   : > { %940 = vrot.lane.b32.xlu2 %v849_v42, %s1962_s19  ;;  %851 = vrot.lane.b32.xlu0 %v849_v42, %s1963_s29  ;;  %s413_s19 = sand.u32 1, %s1570_s22  }
 0x8fe   : > { %s414_s26 = scalar_lea.vmem [#allocation2], %s413_s19  ;;  %s1199_s16 = scalar_lea.sflag [#allocation3], %s413_s19 }
 0x905   : > { %884 = vrot.lane.b32.xlu2 %v849_v42, %s1964_s0  ;;  %s1536_s0 = scalar_lea.hbm %s1947_s12, 2 }
 0x906   : > { %p1538_p1 = scmp.lt.s32.totalorder %s1536_s0, %s1532_s17 }
 0x908   : > { %p1539_p2 = por %p1538_p1, %p1537_p0 }
 0x90a   : > { %p1540_p3 = pnand %p1539_p2, %p1535_p13 }
 0x94f   : > { %v906_v43 = vpop.permute.xlu2 %905 }
 0x957   : > { %v941_v44 = vpop.permute.xlu2 %940 }
 0x958   : > { %v946_v45 = vsel %vm545_vm7, %v941_v44, 0 }
 0x959   : > { %955 = vmatpush.bf16.msrb.mxu2 %v946_v45 }
 0x95f   : > { %v885_v47 = vpop.permute.xlu2 %884 }
 0x960   : > { %v890_v48 = vsel %vm545_vm7, %v885_v47, 0 }
 0x961   : > { %899 = vmatpush.bf16.msra.mxu1 %v890_v48  ;;  %v1024_v48 = vperm.slane %v1853_v25, 1 }
 0x965   : > { %1060 = vmatpush.bf16.msrb.mxu1 %v1425_v38 }
 0x967   : > { %v908_v49 = vpop.permute.xlu0 %907 }
 0x968   : > { %v913_v50 = vsel %vm507_vm5, %v908_v49, 0 }
 0x969   : > { %922 = vmatpush.bf16.xpose.msra.mxu3 %v913_v50  ;;  %v1026_v50 = vperm.slane %v1853_v25, 2 }
 0x96f   : > { %v852_v51 = vpop.permute.xlu0 %851 }
 0x970   : > { %v857_v52 = vsel %vm507_vm5, %v852_v51, 0  ;;  %1345 = vmatmul.msk.bf16.vlgmr.msra.gmra.mxu3 %vm507_vm5, %v906_v43 }
 0x971   : > { %866 = vmatpush.bf16.xpose.msra.mxu0 %v857_v52 }
 0x978   : > { %1343 = vmatmul.msk.bf16.vlgmr.msra.gmra.mxu0 %vm507_vm5, %v849_v42 }
 0x979   : > { %994 = vmatpush.bf16.msrb.mxu0 %v1423_v15 }
 0x97d   : > { %995 = vmatpush.bf16.msrb.mxu0 %v1422_v20  ;;  %v1431_v20 = vld [vmem:[%s1945_s10 + $0x8] sm:$0xff] }
 0x97e   : > { %1181 = vmatpush.bf16.msra.mxu2 %v1431_v20 }
 0x9f3   : > { %v924_v53 = vpop.f32.mrf.mxu3 }
 0x9f4   : > { %v925_v54 = vadd.f32 %v924_v53, %v1742_v46 }
 0x9f5   : > { %v868_v55 = vpop.f32.mrf.mxu0 }
 0x9f6   : > { %v869_v56 = vadd.f32 %v868_v55, %v1742_v46  ;;  %v928_v57 = vsel %vm527_vm6, %v925_v54, -inf  ;;  %v1429_v55 = vld [vmem:[%s1941_s6 + $0x38] sm:$0xff] }
 0x9f7   : > { %929 = vmax.xlane.f32.xlu1 %v928_v57  ;;  %1118 = vmatpush.bf16.msrb.mxu3 %v1429_v55  ;;  %v1427_v57 = vld [vmem:[%s1941_s6 + $0x28] sm:$0xff] }
 0x9f8   : > { %v872_v58 = vsel %vm527_vm6, %v869_v56, -inf }
 0x9f9   : > { %873 = vmax.xlane.f32.xlu0 %v872_v58  ;;  %v1426_v58 = vld [vmem:[%s1941_s6 + $0x20] sm:$0xff] }
 0x9fb   : > { %v926_v59 = vpop.f32.mrf.mxu3 }
 0x9fc   : > { %v1481_v59 = vld [vmem:[%s1943_s8 + $0x1] ss:$0 sm:$0xff] }
 0x9fd   : > { %v870_v60 = vpop.f32.mrf.mxu0 }
 0xa6a   : > { %v930_v61 = vpop.xlane.xlu1 %929 }
 0xa6b   : > { %v931_v62 = vsub.f32 %v925_v54, %v930_v61 }
 0xa6c   : > { %v874_v63 = vpop.xlane.xlu0 %873 }
 0xa6d   : > { %v932_v0 = vmul.f32 1.442695, %v931_v62  ;;  %v875_v1 = vsub.f32 %v869_v56, %v874_v63  ;;  %v1428_v56 = vld [vmem:[%s1941_s6 + $0x30] sm:$0xff] }
 0xa6e   : > { %1119 = vmatpush.bf16.msrb.mxu3 %v1428_v56 }
 0xa6f   : > { %1500 = vpow2.f32 %v932_v0  ;;  %v876_v2 = vmul.f32 1.442695, %v875_v1 }
 0xa71   : > { %1502 = vpow2.f32 %v876_v2 }
 0xa72   : > { %1120 = vmatpush.bf16.msrb.mxu3 %v1427_v57 }
 0xa75   : > { %v1501_v3 = vpop.eup %1500 }
 0xa76   : > { %v934_v4 = vsel %vm527_vm6, %v1501_v3, 0.0  ;;  %1121 = vmatpush.bf16.msrb.mxu3 %v1426_v58 }
 0xa77   : > { %935 = vadd.xlane.f32.xlu1 %v934_v4  ;;  %v1503_v46 = vpop.eup %1502 }
 0xa78   : > { %v878_v5 = vsel %vm527_vm6, %v1503_v46, 0.0 }
 0xa7f   : > { %879 = vadd.xlane.f32.xlu1 %v878_v5 }
 0xaea   : > { %v936_v6 = vpop.xlane.xlu1 %935 }
 0xaeb   : > { %1504 = vrcp.f32 %v936_v6 }
 0xaf1   : > { %v1505_v7 = vpop.eup %1504 }
 0xaf2   : > { %v938_v9 = vmul.f32 %v1505_v7, %v1501_v3  ;;  %v880_v10 = vpop.xlane.xlu1 %879 }
 0xaf3   : > { %1506 = vrcp.f32 %v880_v10 }
 0xaf4   : > { %v939_v11 = vpack.c.bf16 %v938_v9, %v938_v9  ;;  %v1086_v9 = vperm.slane %v1853_v25, 3 }
 0xaf6   : > { %1346 = vmatmul.msk.bf16.vlgmr.msrb.gmra.mxu2 %vm527_vm6, %v939_v11 }
 0xaf9   : > { %v1507_v12 = vpop.eup %1506 }
 0xafa   : > { %v882_v13 = vmul.f32 %v1507_v12, %v1503_v46 }
 0xafc   : > { %v883_v14 = vpack.c.bf16 %v882_v13, %v882_v13 }
 0xafe   : > { %1344 = vmatmul.msk.bf16.vlgmr.msra.gmra.mxu1 %vm527_vm6, %v883_v14 }
 0xb79   : > { %v957_v16 = vpop.f32.mrf.mxu2 }
 0xb7a   : > { %962 = vrot.lane.b32.xlu1 %v957_v16, %s1965_s28  ;;  %s1209_s28 = sshll.u32 %s414_s26, 4  ;;  %s1210_s28 = int_to_ptr.vmem [resolvable:$true] %s1209_s28 }
 0xb7b   : > { %v901_v17 = vpop.f32.mrf.mxu1 }
 0xb81   : > { %v959_v18 = vpop.f32.mrf.mxu2 }
 0xb83   : > { %v903_v19 = vpop.f32.mrf.mxu1 }
 0xbec   : > { %v963_v21 = vpop.permute.xlu1 %962 }
 0xbed   : > { %v965_v22 = vsel %vm507_vm5, %v901_v17, %v963_v21  ;;  %v1430_v21 = vld [vmem:[%s1945_s10] sm:$0xff] }
 0xbee   : > { %v966_v24 = vpack.c.bf16 %v965_v22, %v965_v22  ;;  %1182 = vmatpush.bf16.msra.mxu2 %v1430_v21 }
 0xbf0   : > { %1359 = vmatmul.msk.bf16.vlgmr.msrb.gmra.mxu0 %vm425_vm0, %v966_v24 }
 0xc6d   : > { %v997_v27 = vpop.f32.mrf.mxu0 }
 0xc6e   : > { %v998_v28 = vadd.f32 %v997_v27, %v972_v26 }
 0xc70   : > { %v1001_v29 = vadd.f32 %v998_v28, %v1814_v37  ;;  %v1424_v37 = vld [vmem:[%s1940_s5 + $0x10] sm:$0xff] }
 0xc71   : > { %1061 = vmatpush.bf16.msrb.mxu1 %v1424_v37 }
 0xc72   : > { %v1002_v30 = vsel %vm425_vm0, %v1001_v29, 0.0 }
 0xc73   : > { %1003 = vadd.xlane.f32.xlu2 %v1002_v30 }
 0xc75   : > { %v999_v32 = vpop.f32.mrf.mxu0 }
 0xce6   : > { %v1004_v33 = vpop.xlane.xlu2 %1003 }
 0xce7   : > { %v1005_v34 = vmul.f32 %v1004_v33, %v1709_v8 }
 0xce9   : > { %v1006_v35 = vsub.f32 %v1001_v29, %v1005_v34  ;;  %v1150_v34 = vperm.slane %v1853_v25, 4 }
 0xceb   : > { %v1007_v36 = vmul.f32 %v1006_v35, %v1006_v35 }
 0xced   : > { %v1008_v31 = vsel %vm425_vm0, %v1007_v36, 0.0 }
 0xcee   : > { %1009 = vadd.xlane.f32.xlu0 %v1008_v31  ;;  %v1152_v31 = vperm.slane %v1853_v25, 5 }
 0xd61   : > { %v1010_v39 = vpop.xlane.xlu0 %1009 }
 0xd62   : > { %v1011_v40 = vmul.f32 %v1010_v39, %v1709_v8  ;;  %v1159_v39 = vld [vmem:[%s1946_s11] sm:$0x1] }
 0xd64   : > { %v1012_v41 = vadd.f32 1e-12, %v1011_v40 }
 0xd66   : > { %1508 = vrsqrt.f32 %v1012_v41  ;;  %vm1019_vm1 = vweird.f32 %v1012_v41 }
 0xd6c   : > { %v1509_v42 = vpop.eup %1508 }
 0xd6d   : > { %v1014_v23 = vmul.f32 %v1509_v42, %v1012_v41  ;;  %vm1020_vm15 = vweird.f32 %v1509_v42 }
 0xd6e   : > { %vm1021_vm2 = vmor %vm1019_vm1, %vm1020_vm15 }
 0xd6f   : > { %v1015_v43 = vmul.f32 %v1509_v42, %v1014_v23 }
 0xd71   : > { %v1016_v44 = vmul.f32 0.5, %v1015_v43 }
 0xd73   : > { %v1017_v45 = vsub.f32 1.5, %v1016_v44 }
 0xd75   : > { %v1018_v47 = vmul.f32 %v1509_v42, %v1017_v45 }
 0xd77   : > { %v1022_v49 = vsel %vm1021_vm2, %v1509_v42, %v1018_v47 }
 0xd78   : > { %v1023_v51 = vmul.f32 %v1022_v49, %v1006_v35 }
 0xd7a   : > { %v1025_v52 = vmul.f32 %v1024_v48, %v1023_v51 }
 0xd7c   : > { %v1027_v53 = vadd.f32 %v1026_v50, %v1025_v52 }
 0xd7e   : > { %v1028_v54 = vpack.c.bf16 %v1027_v53, %v1027_v53 }
 0xd80   : > { %1373 = vmatmul.msk.bf16.vlgmr.msrb.gmra.mxu1 %vm425_vm0, %v1028_v54 }
 0xdfd   : > { %v1063_v60 = vpop.f32.mrf.mxu1 }
 0xdfe   : > { %v1064_v61 = vadd.f32 %v1481_v59, %v1063_v60 }
 0xe00   : > { %v1068_v62 = vmul.f32 0.044715, %v1064_v61  ;;  %v1067_v46 = vmul.f32 0.5, %v1064_v61 }
 0xe02   : > { %v1069_v63 = vmul.f32 %v1068_v62, %v1064_v61 }
 0xe04   : > { %v1070_v0 = vmul.f32 %v1069_v63, %v1064_v61 }
 0xe05   : > { %v1065_v1 = vpop.f32.mrf.mxu1 }
 0xe06   : > { %v1071_v2 = vadd.f32 %v1070_v0, %v1064_v61 }
 0xe08   : > { %v1072_v3 = vmul.f32 0.7978846, %v1071_v2 }
 0xe0a   : > { %1510 = vtanh.f32 %v1072_v3 }
 0xe10   : > { %v1511_v4 = vpop.eup %1510 }
 0xe11   : > { %v1074_v5 = vadd.f32 1.0, %v1511_v4 }
 0xe13   : > { %v1075_v6 = vmul.f32 %v1074_v5, %v1067_v46 }
 0xe15   : > { %v1076_v7 = vpack.c.bf16 %v1075_v6, %v1075_v6 }
 0xe17   : > { %1398 = vmatmul.msk.bf16.vlgmr.msrb.gmra.mxu3 %vm764_vm11, %v1076_v7 }
 0xe9a   : > { %v1123_v10 = vpop.f32.mrf.mxu3 }
 0xe9b   : > { %v1124_v11 = vadd.f32 %v1123_v10, %v1086_v9 }
 0xe9d   : > { %v1127_v12 = vadd.f32 %v1124_v11, %v1027_v53 }
 0xe9f   : > { %v1128_v13 = vsel %vm425_vm0, %v1127_v12, 0.0 }
 0xea0   : > { %1129 = vadd.xlane.f32.xlu1 %v1128_v13 }
 0xea2   : > { %v1125_v14 = vpop.f32.mrf.mxu3 }
 0xf13   : > { %v1130_v15 = vpop.xlane.xlu1 %1129 }
 0xf14   : > { %v1131_v16 = vmul.f32 %v1130_v15, %v1709_v8 }
 0xf16   : > { %v1132_v17 = vsub.f32 %v1127_v12, %v1131_v16 }
 0xf18   : > { %v1133_v18 = vmul.f32 %v1132_v17, %v1132_v17 }
 0xf1a   : > { %v1134_v19 = vsel %vm425_vm0, %v1133_v18, 0.0 }
 0xf1b   : > { %1135 = vadd.xlane.f32.xlu0 %v1134_v19 }
 0xf8e   : > { %v1136_v22 = vpop.xlane.xlu0 %1135 }
 0xf8f   : > { %v1137_v24 = vmul.f32 %v1136_v22, %v1709_v8 }
 0xf91   : > { %v1138_v26 = vadd.f32 1e-12, %v1137_v24 }
 0xf93   : > { %1512 = vrsqrt.f32 %v1138_v26  ;;  %vm1145_vm4 = vweird.f32 %v1138_v26 }
 0xf99   : > { %v1513_v27 = vpop.eup %1512 }
 0xf9a   : > { %v1140_v28 = vmul.f32 %v1513_v27, %v1138_v26  ;;  %vm1146_vm3 = vweird.f32 %v1513_v27 }
 0xf9b   : > { %vm1147_vm5 = vmor %vm1145_vm4, %vm1146_vm3 }
 0xf9c   : > { %v1141_v29 = vmul.f32 %v1513_v27, %v1140_v28 }
 0xf9e   : > { %v1142_v30 = vmul.f32 0.5, %v1141_v29 }
 0xfa0   : > { %v1143_v32 = vsub.f32 1.5, %v1142_v30 }
 0xfa2   : > { %v1144_v33 = vmul.f32 %v1513_v27, %v1143_v32 }
 0xfa4   : > { %v1148_v35 = vsel %vm1147_vm5, %v1513_v27, %v1144_v33 }
 0xfa5   : > { %v1149_v36 = vmul.f32 %v1148_v35, %v1132_v17 }
 0xfa7   : > { %v1151_v8 = vmul.f32 %v1150_v34, %v1149_v36 }
 0xfa9   : > { %v1153_v38 = vadd.f32 %v1152_v31, %v1151_v8 }
 0xfab   : > { %v1154_v37 = vpack.c.bf16 %v1153_v38, %v1153_v38 }
 0xfad   : > { %1407 = vmatmul.msk.bf16.vlgmr.msra.gmra.mxu2 %vm425_vm0, %v1154_v37 }
0x1030   : > { %v1184_v40 = vpop.f32.mrf.mxu2 }
0x1031   : > { %v1185_v41 = vadd.f32 %v1184_v40, %v1159_v39 }
0x1033   : > { %v1189_v42 = vmul.f32 0.044715, %v1185_v41  ;;  %v1188_v48 = vmul.f32 0.5, %v1185_v41 }
0x1035   : > { %v1190_v23 = vmul.f32 %v1189_v42, %v1185_v41 }
0x1037   : > { %v1191_v43 = vmul.f32 %v1190_v23, %v1185_v41 }
0x1038   : > { %v1186_v44 = vpop.f32.mrf.mxu2 }
0x1039   : > { %v1192_v45 = vadd.f32 %v1191_v43, %v1185_v41 }
0x103b   : > { %v1193_v47 = vmul.f32 0.7978846, %v1192_v45 }
0x103d   : > { %1514 = vtanh.f32 %v1193_v47 }
0x1043   : > { %v1515_v25 = vpop.eup %1514 }
0x1044   : > { %v1195_v49 = vadd.f32 1.0, %v1515_v25 }
0x1046   : > { %v1196_v50 = vmul.f32 %v1195_v49, %v1188_v48 }
0x1048   : > { %1197 = vst [vmem:[%s414_s26] sm:$0x1] %v1196_v50 }
0x1049   : > { %1543 = shalt.err (!%p1540_p3)
}
0x104a   : > { %1432 = dma.vmem_to_hbm [thread:$0]  (%p1690_p5), %s1210_s28, 16, %s1212_s15, %s1199_s16  }
0x104b PF: > { %p1438_p4 = scmp.ge.s32.totalorder %s1578_s24, 2  ;;  %s1223_s19 = sand.u32 1, %s1566_s21  }
0x104c   : > { %s1224_s26 = scalar_lea.sflag [#allocation3], %s1223_s19 }
0x104d   : > { %p1435_p7 = pnand %p1438_p4, %p1694_p6 }
0x104f   : > { %p1436_p8 = pneg %p1435_p7 }
0x1051   : > { %1561 = dma.done.wait (%p1436_p8), %s1224_s26, 16  }
0x1052   : > { %1563 = vsyncadd (%p1436_p8), %s1224_s26, 4294967280  ;;  %p22_p9 = scmp.ge.s32.totalorder %s1677_s27, 4   ;;  %s1966_s21 = smov %s1570_s22 }
0x1053   : > { %s1967_s22 = smov %s1574_s23  ;;  %s1968_s23 = smov %s1688_s30 }
0x1054   : > { %s1969_s24 = smov %s1677_s27  ;;  %24 = sbr.rel (!%p22_p9) target bundleno = 6 (0x6), region = 113 }
0x1059   :  { %1229 = vsyncpa [#allocation3], 1 }
0x105a   :  { %1231 = vsyncpa [#allocation3 + $0x1], 1 }

</bundles_post_ra>
